<compile_context>
chip_gen: v7x
topology: tpu7x:2x2x1
jax: 0.10.0
libtpu: 0.0.40
codegen_flags: <defaults>
</compile_context>

<pallas_src>
import functools

import jax
import jax.numpy as jnp
from jax.experimental import pallas as pl
from jax.experimental.pallas import tpu as pltpu


def _model_lstm_kernel(action_type, num_actions, T,
                       x_ref, h0_ref, c0_ref,
                       w1_ref, b1_ref, wg_ref, bg_ref, w2_ref, b2_ref,
                       out_ref, hout_ref, cout_ref):
    """Whole rollout: T steps of fc1 + act -> fused LSTM cell -> fc2 + head.

    The time loop lives inside the kernel; h/c are register (vreg) carries.
    """
    Bg = h0_ref.shape[0]
    H = h0_ref.shape[1]
    A_pad = out_ref.shape[-1]

    # Hoist loop-invariant loads / broadcasts out of the serial step body.
    w1 = w1_ref[...]                                     # (S, H)
    wg = wg_ref[...]                                     # (2H, 4H)
    w2 = w2_ref[...]                                     # (H, A_pad)
    b1 = jnp.broadcast_to(b1_ref[...], (Bg, H))
    bg = jnp.broadcast_to(bg_ref[...], (Bg, 4 * H))
    b2 = jnp.broadcast_to(b2_ref[...], (Bg, A_pad))
    if action_type != "conti":
        lane = jax.lax.broadcasted_iota(jnp.int32, (Bg, A_pad), 1)
        pad_mask = lane < num_actions                    # mask padded head lanes

    def step(t, carry):
        h, c = carry                                     # (Bg, H) each, in vregs
        x = x_ref[t]                                     # (Bg, S)

        # fc1 + activation
        a1 = jnp.dot(x, w1, preferred_element_type=jnp.float32) + b1
        a1 = jnp.tanh(a1) if action_type == "conti" else jnp.maximum(a1, 0.0)

        # Fused LSTM gates: one (Bg, 2H) x (2H, 4H) matmul; PyTorch gate
        # order [i, f, g, o] along the 4H lanes.
        ah = jnp.concatenate([a1, h], axis=-1)           # (Bg, 2H)
        pre = jnp.dot(ah, wg, preferred_element_type=jnp.float32) + bg

        # Two full-vreg EUP passes, then static lane slices for the gates.
        sig = jax.nn.sigmoid(pre)
        tnh = jnp.tanh(pre)
        i_g = sig[:, 0 * H:1 * H]
        f_g = sig[:, 1 * H:2 * H]
        g_g = tnh[:, 2 * H:3 * H]
        o_g = sig[:, 3 * H:4 * H]

        c_new = f_g * c + i_g * g_g
        h_new = o_g * jnp.tanh(c_new)

        # fc2 + output head (weights zero-padded to lane-dense A_pad=128).
        if action_type == "conti":
            z = jnp.dot(h_new, w2, preferred_element_type=jnp.float32) + b2
            out_ref[t] = jnp.tanh(z)
        else:
            z = jnp.dot(jnp.maximum(h_new, 0.0), w2,
                        preferred_element_type=jnp.float32) + b2
            z = jnp.where(pad_mask, z, jnp.float32(-1e30))
            m = jnp.max(z, axis=-1, keepdims=True)
            e = jnp.exp(z - m)
            # log-probabilities (z - logsumexp); padded lanes -> huge negative.
            out_ref[t] = (z - m) - jnp.log(jnp.sum(e, axis=-1, keepdims=True))
        return h_new, c_new

    h_fin, c_fin = jax.lax.fori_loop(0, T, step, (h0_ref[...], c0_ref[...]),
                                     unroll=(T <= 16))
    hout_ref[...] = h_fin
    cout_ref[...] = c_fin


def model_lstm_forward_seq(params, xs, hidden, action_type, action_size,
                           *, num_groups=1):
    """Run the whole T-step rollout for B rows in ONE pallas_call.

    xs: (T, B, S).  hidden: (h0, c0) each reshapeable to (B, H).
    num_groups splits the batch into independent groups on a "parallel"
    grid axis (use 2 on v7x with B a multiple of 16 to occupy both TCs).
    Returns (head, (h_T, c_T)) where head is (T, B, A_pad); the first
    `action_size` columns are the valid head outputs (tanh means for "conti",
    log-probabilities for "discr").
    """
    T, B, S = xs.shape
    H = params["w1"].shape[1]
    A_pad = params["w2"].shape[1]
    assert B % num_groups == 0
    Bg = B // num_groups

    h0, c0 = hidden
    h0 = jnp.asarray(h0, jnp.float32).reshape(B, H)
    c0 = jnp.asarray(c0, jnp.float32).reshape(B, H)

    kernel = functools.partial(_model_lstm_kernel, action_type, action_size, T)

    def resident(shape):
        # Whole-array block, identical for every grid step (stays in VMEM).
        n = len(shape)
        return pl.BlockSpec(shape, lambda g, _n=n: (0,) * _n)

    out, h_new, c_new = pl.pallas_call(
        kernel,
        out_shape=(jax.ShapeDtypeStruct((T, B, A_pad), jnp.float32),
                   jax.ShapeDtypeStruct((B, H), jnp.float32),
                   jax.ShapeDtypeStruct((B, H), jnp.float32)),
        grid=(num_groups,),
        in_specs=[
            pl.BlockSpec((T, Bg, S), lambda g: (0, g, 0)),        # xs
            pl.BlockSpec((Bg, H), lambda g: (g, 0)),              # h0
            pl.BlockSpec((Bg, H), lambda g: (g, 0)),              # c0
            resident((S, H)), resident((1, H)),                   # fc1
            resident((2 * H, 4 * H)), resident((1, 4 * H)),       # fused gates
            resident((H, A_pad)), resident((1, A_pad)),           # fc2 (padded)
        ],
        out_specs=(pl.BlockSpec((T, Bg, A_pad), lambda g: (0, g, 0)),
                   pl.BlockSpec((Bg, H), lambda g: (g, 0)),
                   pl.BlockSpec((Bg, H), lambda g: (g, 0))),
        compiler_params=pltpu.CompilerParams(
            dimension_semantics=("parallel",)),   # batch groups are independent
    )(xs.astype(jnp.float32), h0, c0,
      params["w1"], params["b1"],
      params["wg"], params["bg"],
      params["w2"], params["b2"])

    return out, (h_new, c_new)


def model_lstm_forward(params, x, hidden, action_type, action_size):
    """Single-step, batch-1 forward matching the PyTorch module interface.

    x: (state_size,), hidden: (h, c) each (1, 1, H) like nn.LSTM.
    Returns (head (1, action_size), (h', c') each (1, 1, H)).
    """
    S, H = params["w1"].shape
    h0, c0 = hidden
    xs = x.reshape(1, 1, S)
    out, (h_new, c_new) = model_lstm_forward_seq(
        params, xs, (h0.reshape(1, H), c0.reshape(1, H)),
        action_type, action_size)
    return out[0, :, :action_size], (h_new.reshape(1, 1, H),
                                     c_new.reshape(1, 1, H))


def sample_action(key, head, action_type):
    """Stochastic sampling (Normal / Categorical) — plain JAX glue."""
    if action_type == "conti":
        noise = 0.1 * jax.random.normal(key, head.shape, dtype=head.dtype)
        return jnp.clip(head + noise, -1.0, 1.0)
    else:
        # head is log-probabilities; feed categorical directly.
        return jax.random.categorical(key, head, axis=-1)


def init_params(key, state_size, hidden_size, action_size, *, dtype=jnp.float32):
    """Synthetic init mirroring weights_init: weights ~ U(-1, 1)."""
    S, H, A = state_size, hidden_size, action_size
    A_pad = max(128, ((A + 127) // 128) * 128)
    ks = jax.random.split(key, 8)
    fc1_w = jax.random.uniform(ks[0], (H, S), minval=-1.0, maxval=1.0)
    fc1_b = jax.random.uniform(ks[1], (H,), minval=-0.1, maxval=0.1)
    w_ih = jax.random.uniform(ks[2], (4 * H, H), minval=-1.0, maxval=1.0)
    w_hh = jax.random.uniform(ks[3], (4 * H, H), minval=-1.0, maxval=1.0)
    b_ih = jax.random.uniform(ks[4], (4 * H,), minval=-0.1, maxval=0.1)
    b_hh = jax.random.uniform(ks[5], (4 * H,), minval=-0.1, maxval=0.1)
    fc2_w = jax.random.uniform(ks[6], (A, H), minval=-1.0, maxval=1.0)
    fc2_b = jax.random.uniform(ks[7], (A,), minval=-0.1, maxval=0.1)

    # Fused gate weight: rows [0:H] multiply a1, rows [H:2H] multiply h;
    # columns are PyTorch gate order [i, f, g, o].
    wg = jnp.concatenate([w_ih.T, w_hh.T], axis=0)        # (2H, 4H)

    w2 = jnp.zeros((H, A_pad), jnp.float32).at[:, :A].set(fc2_w.T)
    b2 = jnp.zeros((1, A_pad), jnp.float32).at[:, :A].set(fc2_b)

    params = {
        "w1": fc1_w.T,                       # (S, H)
        "b1": fc1_b.reshape(1, H),           # (1, H)
        "wg": wg,                            # (2H, 4H) fused [i,f,g,o] gates
        "bg": (b_ih + b_hh).reshape(1, 4 * H),
        "w2": w2,                            # (H, A_pad) zero-padded
        "b2": b2,                            # (1, A_pad) zero-padded
    }
    return jax.tree.map(lambda a: a.astype(dtype), params)


def _ref_forward_seq(params, xs, h0, c0, action_type, A):
    """Pure-JAX reference of the same recurrence (for a correctness check)."""
    H = params["w1"].shape[1]
    w2 = params["w2"][:, :A]
    b2 = params["b2"][:, :A]

    def step(carry, x):
        h, c = carry
        a1 = x @ params["w1"] + params["b1"]
        a1 = jnp.tanh(a1) if action_type == "conti" else jnp.maximum(a1, 0.0)
        pre = jnp.concatenate([a1, h], axis=-1) @ params["wg"] + params["bg"]
        i = jax.nn.sigmoid(pre[:, 0 * H:1 * H])
        f = jax.nn.sigmoid(pre[:, 1 * H:2 * H])
        g = jnp.tanh(pre[:, 2 * H:3 * H])
        o = jax.nn.sigmoid(pre[:, 3 * H:4 * H])
        c_new = f * c + i * g
        h_new = o * jnp.tanh(c_new)
        if action_type == "conti":
            out = jnp.tanh(h_new @ w2 + b2)
        else:
            out = jax.nn.log_softmax(jnp.maximum(h_new, 0.0) @ w2 + b2, axis=-1)
        return (h_new, c_new), out

    (h, c), outs = jax.lax.scan(step, (h0, c0), xs)
    return outs, (h, c)


if __name__ == "__main__":
    state_size, hidden_size, action_size = 8, 32, 4
    T, B = 8, 8   # time steps per kernel launch, batch of genomes/envs
    # TODO(synk): for GA population rollouts raise B to 128/256 and (on v7x)
    # pass num_groups=2 so both TensorCores are used; demo stays small.

    root = jax.random.PRNGKey(0)
    k_param, k_x, k_c, k_d = jax.random.split(root, 4)

    params = init_params(k_param, state_size, hidden_size, action_size)
    xs = jax.random.normal(k_x, (T, B, state_size), dtype=jnp.float32)
    h0 = jnp.zeros((B, hidden_size), jnp.float32)
    c0 = jnp.zeros((B, hidden_size), jnp.float32)

    # Continuous-action branch: tanh head (+ Normal(0.1) sample + clamp).
    out_c, (h_c, c_c) = model_lstm_forward_seq(
        params, xs, (h0, c0), "conti", action_size)
    head_c = out_c[..., :action_size]
    act_c = sample_action(k_c, head_c[-1], "conti")

    # Discrete-action branch: relu -> fc2 -> log-softmax head (+ Categorical).
    out_d, (h_d, c_d) = model_lstm_forward_seq(
        params, xs, (h0, c0), "discr", action_size)
    logp_d = out_d[..., :action_size]
    act_d = sample_action(k_d, logp_d[-1], "discr")

    # Single-step, batch-1 call matching the original module interface.
    x1 = xs[0, 0]
    h1 = jnp.zeros((1, 1, hidden_size), jnp.float32)
    c1 = jnp.zeros((1, 1, hidden_size), jnp.float32)
    head_1, hidden_1 = model_lstm_forward(params, x1, (h1, c1), "conti",
                                          action_size)

    # Correctness check against the pure-JAX reference.
    ref_c, (rh_c, rc_c) = _ref_forward_seq(params, xs, h0, c0, "conti",
                                           action_size)
    ref_d, (rh_d, rc_d) = _ref_forward_seq(params, xs, h0, c0, "discr",
                                           action_size)
    assert jnp.allclose(head_c, ref_c, atol=2e-3, rtol=2e-3)
    assert jnp.allclose(h_c, rh_c, atol=2e-3, rtol=2e-3)
    assert jnp.allclose(c_c, rc_c, atol=2e-3, rtol=2e-3)
    assert jnp.allclose(logp_d, ref_d, atol=2e-3, rtol=2e-3)
    assert jnp.allclose(h_d, rh_d, atol=2e-3, rtol=2e-3)
    assert jnp.allclose(head_1, ref_c[0, :1], atol=2e-3, rtol=2e-3)

    jax.block_until_ready((head_c, h_c, c_c, act_c,
                           logp_d, h_d, c_d, act_d, head_1, hidden_1))
    print("KERNEL_OK")
</pallas_src>

<mosaic_0001>
module attributes {stable_mosaic.version = 11 : i64} {
  func.func @_model_lstm_kernel(%arg0: i32, %arg1: memref<8x8x8xf32, #tpu.memory_space<vmem>>, %arg2: memref<8x32xf32, #tpu.memory_space<vmem>>, %arg3: memref<8x32xf32, #tpu.memory_space<vmem>>, %arg4: memref<8x32xf32, #tpu.memory_space<vmem>>, %arg5: memref<1x32xf32, #tpu.memory_space<vmem>>, %arg6: memref<64x128xf32, #tpu.memory_space<vmem>>, %arg7: memref<1x128xf32, #tpu.memory_space<vmem>>, %arg8: memref<32x128xf32, #tpu.memory_space<vmem>>, %arg9: memref<1x128xf32, #tpu.memory_space<vmem>>, %arg10: memref<8x8x128xf32, #tpu.memory_space<vmem>>, %arg11: memref<8x32xf32, #tpu.memory_space<vmem>>, %arg12: memref<8x32xf32, #tpu.memory_space<vmem>>) attributes {dimension_semantics = [#tpu.dimension_semantics<parallel>], iteration_bounds = array<i64: 1>, scalar_prefetch = 0 : i64, scratch_operands = 0 : i64, tpu.core_type = #tpu.core_type<tc>, window_params = [{transform_indices = @transform_0, window_bounds = array<i64: 8, 8, 8>}, {transform_indices = @transform_1, window_bounds = array<i64: 8, 32>}, {transform_indices = @transform_2, window_bounds = array<i64: 8, 32>}, {pipeline_mode = #tpu.pipeline_mode<synchronous>, transform_indices = @transform_3, window_bounds = array<i64: 8, 32>}, {pipeline_mode = #tpu.pipeline_mode<synchronous>, transform_indices = @transform_4, window_bounds = array<i64: 1, 32>}, {pipeline_mode = #tpu.pipeline_mode<synchronous>, transform_indices = @transform_5, window_bounds = array<i64: 64, 128>}, {pipeline_mode = #tpu.pipeline_mode<synchronous>, transform_indices = @transform_6, window_bounds = array<i64: 1, 128>}, {pipeline_mode = #tpu.pipeline_mode<synchronous>, transform_indices = @transform_7, window_bounds = array<i64: 32, 128>}, {pipeline_mode = #tpu.pipeline_mode<synchronous>, transform_indices = @transform_8, window_bounds = array<i64: 1, 128>}, {transform_indices = @transform_9, window_bounds = array<i64: 8, 8, 128>}, {transform_indices = @transform_10, window_bounds = array<i64: 8, 32>}, {transform_indices = @transform_11, window_bounds = array<i64: 8, 32>}]} {
    %c0 = arith.constant 0 : index
    %c0_0 = arith.constant 0 : index
    %0 = vector.load %arg4[%c0, %c0_0] : memref<8x32xf32, #tpu.memory_space<vmem>>, vector<8x32xf32>
    %c0_1 = arith.constant 0 : index
    %c0_2 = arith.constant 0 : index
    %1 = vector.load %arg6[%c0_1, %c0_2] : memref<64x128xf32, #tpu.memory_space<vmem>>, vector<64x128xf32>
    %c0_3 = arith.constant 0 : index
    %c0_4 = arith.constant 0 : index
    %2 = vector.load %arg8[%c0_3, %c0_4] : memref<32x128xf32, #tpu.memory_space<vmem>>, vector<32x128xf32>
    %c0_5 = arith.constant 0 : index
    %c0_6 = arith.constant 0 : index
    %3 = vector.load %arg5[%c0_5, %c0_6] : memref<1x32xf32, #tpu.memory_space<vmem>>, vector<1x32xf32>
    %4 = vector.shape_cast %3 : vector<1x32xf32> to vector<1x32xf32>
    %5 = vector.broadcast %4 : vector<1x32xf32> to vector<8x32xf32>
    %c0_7 = arith.constant 0 : index
    %c0_8 = arith.constant 0 : index
    %6 = vector.load %arg7[%c0_7, %c0_8] : memref<1x128xf32, #tpu.memory_space<vmem>>, vector<1x128xf32>
    %7 = vector.shape_cast %6 : vector<1x128xf32> to vector<1x128xf32>
    %8 = vector.broadcast %7 : vector<1x128xf32> to vector<8x128xf32>
    %c0_9 = arith.constant 0 : index
    %c0_10 = arith.constant 0 : index
    %9 = vector.load %arg9[%c0_9, %c0_10] : memref<1x128xf32, #tpu.memory_space<vmem>>, vector<1x128xf32>
    %10 = vector.shape_cast %9 : vector<1x128xf32> to vector<1x128xf32>
    %11 = vector.broadcast %10 : vector<1x128xf32> to vector<8x128xf32>
    %c0_11 = arith.constant 0 : index
    %c0_12 = arith.constant 0 : index
    %12 = vector.load %arg2[%c0_11, %c0_12] : memref<8x32xf32, #tpu.memory_space<vmem>>, vector<8x32xf32>
    %c0_13 = arith.constant 0 : index
    %c0_14 = arith.constant 0 : index
    %13 = vector.load %arg3[%c0_13, %c0_14] : memref<8x32xf32, #tpu.memory_space<vmem>>, vector<8x32xf32>
    %c0_i32 = arith.constant 0 : i32
    %14 = arith.index_cast %c0_i32 : i32 to index
    %c0_15 = arith.constant 0 : index
    %c0_16 = arith.constant 0 : index
    %15 = vector.load %arg1[%14, %c0_15, %c0_16] : memref<8x8x8xf32, #tpu.memory_space<vmem>>, vector<1x8x8xf32>
    %16 = vector.shape_cast %15 : vector<1x8x8xf32> to vector<8x8xf32>
    %cst = arith.constant dense<0.000000e+00> : vector<8x32xf32>
    %17 = tpu.matmul %16, %0, %cst {dimension_numbers = #tpu.dot_dimension_numbers<[1], [0], [0], [1], [0, 0, 1, 1], [], []>} : vector<8x8xf32>, vector<8x32xf32>, vector<8x32xf32> -> vector<8x32xf32>
    %18 = arith.addf %17, %5 : vector<8x32xf32>
    %19 = math.tanh %18 : vector<8x32xf32>
    %20 = tpu.concatenate %19, %12 in 1 : vector<8x32xf32>, vector<8x32xf32> -> vector<8x64xf32>
    %cst_17 = arith.constant dense<0.000000e+00> : vector<8x128xf32>
    %21 = tpu.matmul %20, %1, %cst_17 {dimension_numbers = #tpu.dot_dimension_numbers<[1], [0], [0], [1], [0, 0, 1, 1], [], []>} : vector<8x64xf32>, vector<64x128xf32>, vector<8x128xf32> -> vector<8x128xf32>
    %22 = arith.addf %21, %8 : vector<8x128xf32>
    %23 = arith.negf %22 : vector<8x128xf32>
    %24 = math.exp %23 : vector<8x128xf32>
    %cst_18 = arith.constant 1.000000e+00 : f32
    %25 = vector.broadcast %cst_18 : f32 to vector<8x128xf32>
    %26 = arith.addf %25, %24 : vector<8x128xf32>
    %27 = arith.divf %25, %26 : vector<8x128xf32>
    %28 = math.tanh %22 : vector<8x128xf32>
    %29 = vector.extract_strided_slice %27 {offsets = [0, 0], sizes = [8, 32], strides = [1, 1]} : vector<8x128xf32> to vector<8x32xf32>
    %30 = vector.extract_strided_slice %27 {offsets = [0, 32], sizes = [8, 32], strides = [1, 1]} : vector<8x128xf32> to vector<8x32xf32>
    %31 = vector.extract_strided_slice %28 {offsets = [0, 64], sizes = [8, 32], strides = [1, 1]} : vector<8x128xf32> to vector<8x32xf32>
    %32 = vector.extract_strided_slice %27 {offsets = [0, 96], sizes = [8, 32], strides = [1, 1]} : vector<8x128xf32> to vector<8x32xf32>
    %33 = arith.mulf %30, %13 : vector<8x32xf32>
    %34 = arith.mulf %29, %31 : vector<8x32xf32>
    %35 = arith.addf %33, %34 : vector<8x32xf32>
    %36 = math.tanh %35 : vector<8x32xf32>
    %37 = arith.mulf %32, %36 : vector<8x32xf32>
    %cst_19 = arith.constant dense<0.000000e+00> : vector<8x128xf32>
    %38 = tpu.matmul %37, %2, %cst_19 {dimension_numbers = #tpu.dot_dimension_numbers<[1], [0], [0], [1], [0, 0, 1, 1], [], []>} : vector<8x32xf32>, vector<32x128xf32>, vector<8x128xf32> -> vector<8x128xf32>
    %39 = arith.addf %38, %11 : vector<8x128xf32>
    %40 = math.tanh %39 : vector<8x128xf32>
    %41 = arith.index_cast %c0_i32 : i32 to index
    %c0_20 = arith.constant 0 : index
    %c0_21 = arith.constant 0 : index
    %42 = vector.load %arg10[%41, %c0_20, %c0_21] : memref<8x8x128xf32, #tpu.memory_space<vmem>>, vector<1x8x128xf32>
    %43 = vector.shape_cast %42 : vector<1x8x128xf32> to vector<8x128xf32>
    %44 = vector.shape_cast %40 : vector<8x128xf32> to vector<1x8x128xf32>
    tpu.vector_store %arg10[%41, %c0_20, %c0_21], %44 {strides = array<i32>} : memref<8x8x128xf32, #tpu.memory_space<vmem>>, vector<1x8x128xf32>,
    %c1_i32 = arith.constant 1 : i32
    %45 = arith.index_cast %c1_i32 : i32 to index
    %c0_22 = arith.constant 0 : index
    %c0_23 = arith.constant 0 : index
    %46 = vector.load %arg1[%45, %c0_22, %c0_23] : memref<8x8x8xf32, #tpu.memory_space<vmem>>, vector<1x8x8xf32>
    %47 = vector.shape_cast %46 : vector<1x8x8xf32> to vector<8x8xf32>
    %cst_24 = arith.constant dense<0.000000e+00> : vector<8x32xf32>
    %48 = tpu.matmul %47, %0, %cst_24 {dimension_numbers = #tpu.dot_dimension_numbers<[1], [0], [0], [1], [0, 0, 1, 1], [], []>} : vector<8x8xf32>, vector<8x32xf32>, vector<8x32xf32> -> vector<8x32xf32>
    %49 = arith.addf %48, %5 : vector<8x32xf32>
    %50 = math.tanh %49 : vector<8x32xf32>
    %51 = tpu.concatenate %50, %37 in 1 : vector<8x32xf32>, vector<8x32xf32> -> vector<8x64xf32>
    %cst_25 = arith.constant dense<0.000000e+00> : vector<8x128xf32>
    %52 = tpu.matmul %51, %1, %cst_25 {dimension_numbers = #tpu.dot_dimension_numbers<[1], [0], [0], [1], [0, 0, 1, 1], [], []>} : vector<8x64xf32>, vector<64x128xf32>, vector<8x128xf32> -> vector<8x128xf32>
    %53 = arith.addf %52, %8 : vector<8x128xf32>
    %54 = arith.negf %53 : vector<8x128xf32>
    %55 = math.exp %54 : vector<8x128xf32>
    %cst_26 = arith.constant 1.000000e+00 : f32
    %56 = vector.broadcast %cst_26 : f32 to vector<8x128xf32>
    %57 = arith.addf %56, %55 : vector<8x128xf32>
    %58 = arith.divf %56, %57 : vector<8x128xf32>
    %59 = math.tanh %53 : vector<8x128xf32>
    %60 = vector.extract_strided_slice %58 {offsets = [0, 0], sizes = [8, 32], strides = [1, 1]} : vector<8x128xf32> to vector<8x32xf32>
    %61 = vector.extract_strided_slice %58 {offsets = [0, 32], sizes = [8, 32], strides = [1, 1]} : vector<8x128xf32> to vector<8x32xf32>
    %62 = vector.extract_strided_slice %59 {offsets = [0, 64], sizes = [8, 32], strides = [1, 1]} : vector<8x128xf32> to vector<8x32xf32>
    %63 = vector.extract_strided_slice %58 {offsets = [0, 96], sizes = [8, 32], strides = [1, 1]} : vector<8x128xf32> to vector<8x32xf32>
    %64 = arith.mulf %61, %35 : vector<8x32xf32>
    %65 = arith.mulf %60, %62 : vector<8x32xf32>
    %66 = arith.addf %64, %65 : vector<8x32xf32>
    %67 = math.tanh %66 : vector<8x32xf32>
    %68 = arith.mulf %63, %67 : vector<8x32xf32>
    %cst_27 = arith.constant dense<0.000000e+00> : vector<8x128xf32>
    %69 = tpu.matmul %68, %2, %cst_27 {dimension_numbers = #tpu.dot_dimension_numbers<[1], [0], [0], [1], [0, 0, 1, 1], [], []>} : vector<8x32xf32>, vector<32x128xf32>, vector<8x128xf32> -> vector<8x128xf32>
    %70 = arith.addf %69, %11 : vector<8x128xf32>
    %71 = math.tanh %70 : vector<8x128xf32>
    %72 = arith.index_cast %c1_i32 : i32 to index
    %c0_28 = arith.constant 0 : index
    %c0_29 = arith.constant 0 : index
    %73 = vector.load %arg10[%72, %c0_28, %c0_29] : memref<8x8x128xf32, #tpu.memory_space<vmem>>, vector<1x8x128xf32>
    %74 = vector.shape_cast %73 : vector<1x8x128xf32> to vector<8x128xf32>
    %75 = vector.shape_cast %71 : vector<8x128xf32> to vector<1x8x128xf32>
    tpu.vector_store %arg10[%72, %c0_28, %c0_29], %75 {strides = array<i32>} : memref<8x8x128xf32, #tpu.memory_space<vmem>>, vector<1x8x128xf32>,
    %c2_i32 = arith.constant 2 : i32
    %76 = arith.index_cast %c2_i32 : i32 to index
    %c0_30 = arith.constant 0 : index
    %c0_31 = arith.constant 0 : index
    %77 = vector.load %arg1[%76, %c0_30, %c0_31] : memref<8x8x8xf32, #tpu.memory_space<vmem>>, vector<1x8x8xf32>
    %78 = vector.shape_cast %77 : vector<1x8x8xf32> to vector<8x8xf32>
    %cst_32 = arith.constant dense<0.000000e+00> : vector<8x32xf32>
    %79 = tpu.matmul %78, %0, %cst_32 {dimension_numbers = #tpu.dot_dimension_numbers<[1], [0], [0], [1], [0, 0, 1, 1], [], []>} : vector<8x8xf32>, vector<8x32xf32>, vector<8x32xf32> -> vector<8x32xf32>
    %80 = arith.addf %79, %5 : vector<8x32xf32>
    %81 = math.tanh %80 : vector<8x32xf32>
    %82 = tpu.concatenate %81, %68 in 1 : vector<8x32xf32>, vector<8x32xf32> -> vector<8x64xf32>
    %cst_33 = arith.constant dense<0.000000e+00> : vector<8x128xf32>
    %83 = tpu.matmul %82, %1, %cst_33 {dimension_numbers = #tpu.dot_dimension_numbers<[1], [0], [0], [1], [0, 0, 1, 1], [], []>} : vector<8x64xf32>, vector<64x128xf32>, vector<8x128xf32> -> vector<8x128xf32>
    %84 = arith.addf %83, %8 : vector<8x128xf32>
    %85 = arith.negf %84 : vector<8x128xf32>
    %86 = math.exp %85 : vector<8x128xf32>
    %cst_34 = arith.constant 1.000000e+00 : f32
    %87 = vector.broadcast %cst_34 : f32 to vector<8x128xf32>
    %88 = arith.addf %87, %86 : vector<8x128xf32>
    %89 = arith.divf %87, %88 : vector<8x128xf32>
    %90 = math.tanh %84 : vector<8x128xf32>
    %91 = vector.extract_strided_slice %89 {offsets = [0, 0], sizes = [8, 32], strides = [1, 1]} : vector<8x128xf32> to vector<8x32xf32>
    %92 = vector.extract_strided_slice %89 {offsets = [0, 32], sizes = [8, 32], strides = [1, 1]} : vector<8x128xf32> to vector<8x32xf32>
    %93 = vector.extract_strided_slice %90 {offsets = [0, 64], sizes = [8, 32], strides = [1, 1]} : vector<8x128xf32> to vector<8x32xf32>
    %94 = vector.extract_strided_slice %89 {offsets = [0, 96], sizes = [8, 32], strides = [1, 1]} : vector<8x128xf32> to vector<8x32xf32>
    %95 = arith.mulf %92, %66 : vector<8x32xf32>
    %96 = arith.mulf %91, %93 : vector<8x32xf32>
    %97 = arith.addf %95, %96 : vector<8x32xf32>
    %98 = math.tanh %97 : vector<8x32xf32>
    %99 = arith.mulf %94, %98 : vector<8x32xf32>
    %cst_35 = arith.constant dense<0.000000e+00> : vector<8x128xf32>
    %100 = tpu.matmul %99, %2, %cst_35 {dimension_numbers = #tpu.dot_dimension_numbers<[1], [0], [0], [1], [0, 0, 1, 1], [], []>} : vector<8x32xf32>, vector<32x128xf32>, vector<8x128xf32> -> vector<8x128xf32>
    %101 = arith.addf %100, %11 : vector<8x128xf32>
    %102 = math.tanh %101 : vector<8x128xf32>
    %103 = arith.index_cast %c2_i32 : i32 to index
    %c0_36 = arith.constant 0 : index
    %c0_37 = arith.constant 0 : index
    %104 = vector.load %arg10[%103, %c0_36, %c0_37] : memref<8x8x128xf32, #tpu.memory_space<vmem>>, vector<1x8x128xf32>
    %105 = vector.shape_cast %104 : vector<1x8x128xf32> to vector<8x128xf32>
    %106 = vector.shape_cast %102 : vector<8x128xf32> to vector<1x8x128xf32>
    tpu.vector_store %arg10[%103, %c0_36, %c0_37], %106 {strides = array<i32>} : memref<8x8x128xf32, #tpu.memory_space<vmem>>, vector<1x8x128xf32>,
    %c3_i32 = arith.constant 3 : i32
    %107 = arith.index_cast %c3_i32 : i32 to index
    %c0_38 = arith.constant 0 : index
    %c0_39 = arith.constant 0 : index
    %108 = vector.load %arg1[%107, %c0_38, %c0_39] : memref<8x8x8xf32, #tpu.memory_space<vmem>>, vector<1x8x8xf32>
    %109 = vector.shape_cast %108 : vector<1x8x8xf32> to vector<8x8xf32>
    %cst_40 = arith.constant dense<0.000000e+00> : vector<8x32xf32>
    %110 = tpu.matmul %109, %0, %cst_40 {dimension_numbers = #tpu.dot_dimension_numbers<[1], [0], [0], [1], [0, 0, 1, 1], [], []>} : vector<8x8xf32>, vector<8x32xf32>, vector<8x32xf32> -> vector<8x32xf32>
    %111 = arith.addf %110, %5 : vector<8x32xf32>
    %112 = math.tanh %111 : vector<8x32xf32>
    %113 = tpu.concatenate %112, %99 in 1 : vector<8x32xf32>, vector<8x32xf32> -> vector<8x64xf32>
    %cst_41 = arith.constant dense<0.000000e+00> : vector<8x128xf32>
    %114 = tpu.matmul %113, %1, %cst_41 {dimension_numbers = #tpu.dot_dimension_numbers<[1], [0], [0], [1], [0, 0, 1, 1], [], []>} : vector<8x64xf32>, vector<64x128xf32>, vector<8x128xf32> -> vector<8x128xf32>
    %115 = arith.addf %114, %8 : vector<8x128xf32>
    %116 = arith.negf %115 : vector<8x128xf32>
    %117 = math.exp %116 : vector<8x128xf32>
    %cst_42 = arith.constant 1.000000e+00 : f32
    %118 = vector.broadcast %cst_42 : f32 to vector<8x128xf32>
    %119 = arith.addf %118, %117 : vector<8x128xf32>
    %120 = arith.divf %118, %119 : vector<8x128xf32>
    %121 = math.tanh %115 : vector<8x128xf32>
    %122 = vector.extract_strided_slice %120 {offsets = [0, 0], sizes = [8, 32], strides = [1, 1]} : vector<8x128xf32> to vector<8x32xf32>
    %123 = vector.extract_strided_slice %120 {offsets = [0, 32], sizes = [8, 32], strides = [1, 1]} : vector<8x128xf32> to vector<8x32xf32>
    %124 = vector.extract_strided_slice %121 {offsets = [0, 64], sizes = [8, 32], strides = [1, 1]} : vector<8x128xf32> to vector<8x32xf32>
    %125 = vector.extract_strided_slice %120 {offsets = [0, 96], sizes = [8, 32], strides = [1, 1]} : vector<8x128xf32> to vector<8x32xf32>
    %126 = arith.mulf %123, %97 : vector<8x32xf32>
    %127 = arith.mulf %122, %124 : vector<8x32xf32>
    %128 = arith.addf %126, %127 : vector<8x32xf32>
    %129 = math.tanh %128 : vector<8x32xf32>
    %130 = arith.mulf %125, %129 : vector<8x32xf32>
    %cst_43 = arith.constant dense<0.000000e+00> : vector<8x128xf32>
    %131 = tpu.matmul %130, %2, %cst_43 {dimension_numbers = #tpu.dot_dimension_numbers<[1], [0], [0], [1], [0, 0, 1, 1], [], []>} : vector<8x32xf32>, vector<32x128xf32>, vector<8x128xf32> -> vector<8x128xf32>
    %132 = arith.addf %131, %11 : vector<8x128xf32>
    %133 = math.tanh %132 : vector<8x128xf32>
    %134 = arith.index_cast %c3_i32 : i32 to index
    %c0_44 = arith.constant 0 : index
    %c0_45 = arith.constant 0 : index
    %135 = vector.load %arg10[%134, %c0_44, %c0_45] : memref<8x8x128xf32, #tpu.memory_space<vmem>>, vector<1x8x128xf32>
    %136 = vector.shape_cast %135 : vector<1x8x128xf32> to vector<8x128xf32>
    %137 = vector.shape_cast %133 : vector<8x128xf32> to vector<1x8x128xf32>
    tpu.vector_store %arg10[%134, %c0_44, %c0_45], %137 {strides = array<i32>} : memref<8x8x128xf32, #tpu.memory_space<vmem>>, vector<1x8x128xf32>,
    %c4_i32 = arith.constant 4 : i32
    %138 = arith.index_cast %c4_i32 : i32 to index
    %c0_46 = arith.constant 0 : index
    %c0_47 = arith.constant 0 : index
    %139 = vector.load %arg1[%138, %c0_46, %c0_47] : memref<8x8x8xf32, #tpu.memory_space<vmem>>, vector<1x8x8xf32>
    %140 = vector.shape_cast %139 : vector<1x8x8xf32> to vector<8x8xf32>
    %cst_48 = arith.constant dense<0.000000e+00> : vector<8x32xf32>
    %141 = tpu.matmul %140, %0, %cst_48 {dimension_numbers = #tpu.dot_dimension_numbers<[1], [0], [0], [1], [0, 0, 1, 1], [], []>} : vector<8x8xf32>, vector<8x32xf32>, vector<8x32xf32> -> vector<8x32xf32>
    %142 = arith.addf %141, %5 : vector<8x32xf32>
    %143 = math.tanh %142 : vector<8x32xf32>
    %144 = tpu.concatenate %143, %130 in 1 : vector<8x32xf32>, vector<8x32xf32> -> vector<8x64xf32>
    %cst_49 = arith.constant dense<0.000000e+00> : vector<8x128xf32>
    %145 = tpu.matmul %144, %1, %cst_49 {dimension_numbers = #tpu.dot_dimension_numbers<[1], [0], [0], [1], [0, 0, 1, 1], [], []>} : vector<8x64xf32>, vector<64x128xf32>, vector<8x128xf32> -> vector<8x128xf32>
    %146 = arith.addf %145, %8 : vector<8x128xf32>
    %147 = arith.negf %146 : vector<8x128xf32>
    %148 = math.exp %147 : vector<8x128xf32>
    %cst_50 = arith.constant 1.000000e+00 : f32
    %149 = vector.broadcast %cst_50 : f32 to vector<8x128xf32>
    %150 = arith.addf %149, %148 : vector<8x128xf32>
    %151 = arith.divf %149, %150 : vector<8x128xf32>
    %152 = math.tanh %146 : vector<8x128xf32>
    %153 = vector.extract_strided_slice %151 {offsets = [0, 0], sizes = [8, 32], strides = [1, 1]} : vector<8x128xf32> to vector<8x32xf32>
    %154 = vector.extract_strided_slice %151 {offsets = [0, 32], sizes = [8, 32], strides = [1, 1]} : vector<8x128xf32> to vector<8x32xf32>
    %155 = vector.extract_strided_slice %152 {offsets = [0, 64], sizes = [8, 32], strides = [1, 1]} : vector<8x128xf32> to vector<8x32xf32>
    %156 = vector.extract_strided_slice %151 {offsets = [0, 96], sizes = [8, 32], strides = [1, 1]} : vector<8x128xf32> to vector<8x32xf32>
    %157 = arith.mulf %154, %128 : vector<8x32xf32>
    %158 = arith.mulf %153, %155 : vector<8x32xf32>
    %159 = arith.addf %157, %158 : vector<8x32xf32>
    %160 = math.tanh %159 : vector<8x32xf32>
    %161 = arith.mulf %156, %160 : vector<8x32xf32>
    %cst_51 = arith.constant dense<0.000000e+00> : vector<8x128xf32>
    %162 = tpu.matmul %161, %2, %cst_51 {dimension_numbers = #tpu.dot_dimension_numbers<[1], [0], [0], [1], [0, 0, 1, 1], [], []>} : vector<8x32xf32>, vector<32x128xf32>, vector<8x128xf32> -> vector<8x128xf32>
    %163 = arith.addf %162, %11 : vector<8x128xf32>
    %164 = math.tanh %163 : vector<8x128xf32>
    %165 = arith.index_cast %c4_i32 : i32 to index
    %c0_52 = arith.constant 0 : index
    %c0_53 = arith.constant 0 : index
    %166 = vector.load %arg10[%165, %c0_52, %c0_53] : memref<8x8x128xf32, #tpu.memory_space<vmem>>, vector<1x8x128xf32>
    %167 = vector.shape_cast %166 : vector<1x8x128xf32> to vector<8x128xf32>
    %168 = vector.shape_cast %164 : vector<8x128xf32> to vector<1x8x128xf32>
    tpu.vector_store %arg10[%165, %c0_52, %c0_53], %168 {strides = array<i32>} : memref<8x8x128xf32, #tpu.memory_space<vmem>>, vector<1x8x128xf32>,
    %c5_i32 = arith.constant 5 : i32
    %169 = arith.index_cast %c5_i32 : i32 to index
    %c0_54 = arith.constant 0 : index
    %c0_55 = arith.constant 0 : index
    %170 = vector.load %arg1[%169, %c0_54, %c0_55] : memref<8x8x8xf32, #tpu.memory_space<vmem>>, vector<1x8x8xf32>
    %171 = vector.shape_cast %170 : vector<1x8x8xf32> to vector<8x8xf32>
    %cst_56 = arith.constant dense<0.000000e+00> : vector<8x32xf32>
    %172 = tpu.matmul %171, %0, %cst_56 {dimension_numbers = #tpu.dot_dimension_numbers<[1], [0], [0], [1], [0, 0, 1, 1], [], []>} : vector<8x8xf32>, vector<8x32xf32>, vector<8x32xf32> -> vector<8x32xf32>
    %173 = arith.addf %172, %5 : vector<8x32xf32>
    %174 = math.tanh %173 : vector<8x32xf32>
    %175 = tpu.concatenate %174, %161 in 1 : vector<8x32xf32>, vector<8x32xf32> -> vector<8x64xf32>
    %cst_57 = arith.constant dense<0.000000e+00> : vector<8x128xf32>
    %176 = tpu.matmul %175, %1, %cst_57 {dimension_numbers = #tpu.dot_dimension_numbers<[1], [0], [0], [1], [0, 0, 1, 1], [], []>} : vector<8x64xf32>, vector<64x128xf32>, vector<8x128xf32> -> vector<8x128xf32>
    %177 = arith.addf %176, %8 : vector<8x128xf32>
    %178 = arith.negf %177 : vector<8x128xf32>
    %179 = math.exp %178 : vector<8x128xf32>
    %cst_58 = arith.constant 1.000000e+00 : f32
    %180 = vector.broadcast %cst_58 : f32 to vector<8x128xf32>
    %181 = arith.addf %180, %179 : vector<8x128xf32>
    %182 = arith.divf %180, %181 : vector<8x128xf32>
    %183 = math.tanh %177 : vector<8x128xf32>
    %184 = vector.extract_strided_slice %182 {offsets = [0, 0], sizes = [8, 32], strides = [1, 1]} : vector<8x128xf32> to vector<8x32xf32>
    %185 = vector.extract_strided_slice %182 {offsets = [0, 32], sizes = [8, 32], strides = [1, 1]} : vector<8x128xf32> to vector<8x32xf32>
    %186 = vector.extract_strided_slice %183 {offsets = [0, 64], sizes = [8, 32], strides = [1, 1]} : vector<8x128xf32> to vector<8x32xf32>
    %187 = vector.extract_strided_slice %182 {offsets = [0, 96], sizes = [8, 32], strides = [1, 1]} : vector<8x128xf32> to vector<8x32xf32>
    %188 = arith.mulf %185, %159 : vector<8x32xf32>
    %189 = arith.mulf %184, %186 : vector<8x32xf32>
    %190 = arith.addf %188, %189 : vector<8x32xf32>
    %191 = math.tanh %190 : vector<8x32xf32>
    %192 = arith.mulf %187, %191 : vector<8x32xf32>
    %cst_59 = arith.constant dense<0.000000e+00> : vector<8x128xf32>
    %193 = tpu.matmul %192, %2, %cst_59 {dimension_numbers = #tpu.dot_dimension_numbers<[1], [0], [0], [1], [0, 0, 1, 1], [], []>} : vector<8x32xf32>, vector<32x128xf32>, vector<8x128xf32> -> vector<8x128xf32>
    %194 = arith.addf %193, %11 : vector<8x128xf32>
    %195 = math.tanh %194 : vector<8x128xf32>
    %196 = arith.index_cast %c5_i32 : i32 to index
    %c0_60 = arith.constant 0 : index
    %c0_61 = arith.constant 0 : index
    %197 = vector.load %arg10[%196, %c0_60, %c0_61] : memref<8x8x128xf32, #tpu.memory_space<vmem>>, vector<1x8x128xf32>
    %198 = vector.shape_cast %197 : vector<1x8x128xf32> to vector<8x128xf32>
    %199 = vector.shape_cast %195 : vector<8x128xf32> to vector<1x8x128xf32>
    tpu.vector_store %arg10[%196, %c0_60, %c0_61], %199 {strides = array<i32>} : memref<8x8x128xf32, #tpu.memory_space<vmem>>, vector<1x8x128xf32>,
    %c6_i32 = arith.constant 6 : i32
    %200 = arith.index_cast %c6_i32 : i32 to index
    %c0_62 = arith.constant 0 : index
    %c0_63 = arith.constant 0 : index
    %201 = vector.load %arg1[%200, %c0_62, %c0_63] : memref<8x8x8xf32, #tpu.memory_space<vmem>>, vector<1x8x8xf32>
    %202 = vector.shape_cast %201 : vector<1x8x8xf32> to vector<8x8xf32>
    %cst_64 = arith.constant dense<0.000000e+00> : vector<8x32xf32>
    %203 = tpu.matmul %202, %0, %cst_64 {dimension_numbers = #tpu.dot_dimension_numbers<[1], [0], [0], [1], [0, 0, 1, 1], [], []>} : vector<8x8xf32>, vector<8x32xf32>, vector<8x32xf32> -> vector<8x32xf32>
    %204 = arith.addf %203, %5 : vector<8x32xf32>
    %205 = math.tanh %204 : vector<8x32xf32>
    %206 = tpu.concatenate %205, %192 in 1 : vector<8x32xf32>, vector<8x32xf32> -> vector<8x64xf32>
    %cst_65 = arith.constant dense<0.000000e+00> : vector<8x128xf32>
    %207 = tpu.matmul %206, %1, %cst_65 {dimension_numbers = #tpu.dot_dimension_numbers<[1], [0], [0], [1], [0, 0, 1, 1], [], []>} : vector<8x64xf32>, vector<64x128xf32>, vector<8x128xf32> -> vector<8x128xf32>
    %208 = arith.addf %207, %8 : vector<8x128xf32>
    %209 = arith.negf %208 : vector<8x128xf32>
    %210 = math.exp %209 : vector<8x128xf32>
    %cst_66 = arith.constant 1.000000e+00 : f32
    %211 = vector.broadcast %cst_66 : f32 to vector<8x128xf32>
    %212 = arith.addf %211, %210 : vector<8x128xf32>
    %213 = arith.divf %211, %212 : vector<8x128xf32>
    %214 = math.tanh %208 : vector<8x128xf32>
    %215 = vector.extract_strided_slice %213 {offsets = [0, 0], sizes = [8, 32], strides = [1, 1]} : vector<8x128xf32> to vector<8x32xf32>
    %216 = vector.extract_strided_slice %213 {offsets = [0, 32], sizes = [8, 32], strides = [1, 1]} : vector<8x128xf32> to vector<8x32xf32>
    %217 = vector.extract_strided_slice %214 {offsets = [0, 64], sizes = [8, 32], strides = [1, 1]} : vector<8x128xf32> to vector<8x32xf32>
    %218 = vector.extract_strided_slice %213 {offsets = [0, 96], sizes = [8, 32], strides = [1, 1]} : vector<8x128xf32> to vector<8x32xf32>
    %219 = arith.mulf %216, %190 : vector<8x32xf32>
    %220 = arith.mulf %215, %217 : vector<8x32xf32>
    %221 = arith.addf %219, %220 : vector<8x32xf32>
    %222 = math.tanh %221 : vector<8x32xf32>
    %223 = arith.mulf %218, %222 : vector<8x32xf32>
    %cst_67 = arith.constant dense<0.000000e+00> : vector<8x128xf32>
    %224 = tpu.matmul %223, %2, %cst_67 {dimension_numbers = #tpu.dot_dimension_numbers<[1], [0], [0], [1], [0, 0, 1, 1], [], []>} : vector<8x32xf32>, vector<32x128xf32>, vector<8x128xf32> -> vector<8x128xf32>
    %225 = arith.addf %224, %11 : vector<8x128xf32>
    %226 = math.tanh %225 : vector<8x128xf32>
    %227 = arith.index_cast %c6_i32 : i32 to index
    %c0_68 = arith.constant 0 : index
    %c0_69 = arith.constant 0 : index
    %228 = vector.load %arg10[%227, %c0_68, %c0_69] : memref<8x8x128xf32, #tpu.memory_space<vmem>>, vector<1x8x128xf32>
    %229 = vector.shape_cast %228 : vector<1x8x128xf32> to vector<8x128xf32>
    %230 = vector.shape_cast %226 : vector<8x128xf32> to vector<1x8x128xf32>
    tpu.vector_store %arg10[%227, %c0_68, %c0_69], %230 {strides = array<i32>} : memref<8x8x128xf32, #tpu.memory_space<vmem>>, vector<1x8x128xf32>,
    %c7_i32 = arith.constant 7 : i32
    %231 = arith.index_cast %c7_i32 : i32 to index
    %c0_70 = arith.constant 0 : index
    %c0_71 = arith.constant 0 : index
    %232 = vector.load %arg1[%231, %c0_70, %c0_71] : memref<8x8x8xf32, #tpu.memory_space<vmem>>, vector<1x8x8xf32>
    %233 = vector.shape_cast %232 : vector<1x8x8xf32> to vector<8x8xf32>
    %cst_72 = arith.constant dense<0.000000e+00> : vector<8x32xf32>
    %234 = tpu.matmul %233, %0, %cst_72 {dimension_numbers = #tpu.dot_dimension_numbers<[1], [0], [0], [1], [0, 0, 1, 1], [], []>} : vector<8x8xf32>, vector<8x32xf32>, vector<8x32xf32> -> vector<8x32xf32>
    %235 = arith.addf %234, %5 : vector<8x32xf32>
    %236 = math.tanh %235 : vector<8x32xf32>
    %237 = tpu.concatenate %236, %223 in 1 : vector<8x32xf32>, vector<8x32xf32> -> vector<8x64xf32>
    %cst_73 = arith.constant dense<0.000000e+00> : vector<8x128xf32>
    %238 = tpu.matmul %237, %1, %cst_73 {dimension_numbers = #tpu.dot_dimension_numbers<[1], [0], [0], [1], [0, 0, 1, 1], [], []>} : vector<8x64xf32>, vector<64x128xf32>, vector<8x128xf32> -> vector<8x128xf32>
    %239 = arith.addf %238, %8 : vector<8x128xf32>
    %240 = arith.negf %239 : vector<8x128xf32>
    %241 = math.exp %240 : vector<8x128xf32>
    %cst_74 = arith.constant 1.000000e+00 : f32
    %242 = vector.broadcast %cst_74 : f32 to vector<8x128xf32>
    %243 = arith.addf %242, %241 : vector<8x128xf32>
    %244 = arith.divf %242, %243 : vector<8x128xf32>
    %245 = math.tanh %239 : vector<8x128xf32>
    %246 = vector.extract_strided_slice %244 {offsets = [0, 0], sizes = [8, 32], strides = [1, 1]} : vector<8x128xf32> to vector<8x32xf32>
    %247 = vector.extract_strided_slice %244 {offsets = [0, 32], sizes = [8, 32], strides = [1, 1]} : vector<8x128xf32> to vector<8x32xf32>
    %248 = vector.extract_strided_slice %245 {offsets = [0, 64], sizes = [8, 32], strides = [1, 1]} : vector<8x128xf32> to vector<8x32xf32>
    %249 = vector.extract_strided_slice %244 {offsets = [0, 96], sizes = [8, 32], strides = [1, 1]} : vector<8x128xf32> to vector<8x32xf32>
    %250 = arith.mulf %247, %221 : vector<8x32xf32>
    %251 = arith.mulf %246, %248 : vector<8x32xf32>
    %252 = arith.addf %250, %251 : vector<8x32xf32>
    %253 = math.tanh %252 : vector<8x32xf32>
    %254 = arith.mulf %249, %253 : vector<8x32xf32>
    %cst_75 = arith.constant dense<0.000000e+00> : vector<8x128xf32>
    %255 = tpu.matmul %254, %2, %cst_75 {dimension_numbers = #tpu.dot_dimension_numbers<[1], [0], [0], [1], [0, 0, 1, 1], [], []>} : vector<8x32xf32>, vector<32x128xf32>, vector<8x128xf32> -> vector<8x128xf32>
    %256 = arith.addf %255, %11 : vector<8x128xf32>
    %257 = math.tanh %256 : vector<8x128xf32>
    %258 = arith.index_cast %c7_i32 : i32 to index
    %c0_76 = arith.constant 0 : index
    %c0_77 = arith.constant 0 : index
    %259 = vector.load %arg10[%258, %c0_76, %c0_77] : memref<8x8x128xf32, #tpu.memory_space<vmem>>, vector<1x8x128xf32>
    %260 = vector.shape_cast %259 : vector<1x8x128xf32> to vector<8x128xf32>
    %261 = vector.shape_cast %257 : vector<8x128xf32> to vector<1x8x128xf32>
    tpu.vector_store %arg10[%258, %c0_76, %c0_77], %261 {strides = array<i32>} : memref<8x8x128xf32, #tpu.memory_space<vmem>>, vector<1x8x128xf32>,
    %c8_i32 = arith.constant 8 : i32
    %c0_78 = arith.constant 0 : index
    %c0_79 = arith.constant 0 : index
    %262 = vector.load %arg11[%c0_78, %c0_79] : memref<8x32xf32, #tpu.memory_space<vmem>>, vector<8x32xf32>
    tpu.vector_store %arg11[%c0_78, %c0_79], %254 {strides = array<i32>} : memref<8x32xf32, #tpu.memory_space<vmem>>, vector<8x32xf32>,
    %c0_80 = arith.constant 0 : index
    %c0_81 = arith.constant 0 : index
    %263 = vector.load %arg12[%c0_80, %c0_81] : memref<8x32xf32, #tpu.memory_space<vmem>>, vector<8x32xf32>
    tpu.vector_store %arg12[%c0_80, %c0_81], %252 {strides = array<i32>} : memref<8x32xf32, #tpu.memory_space<vmem>>, vector<8x32xf32>,
    return
  }
  func.func @transform_0(%arg0: i32) -> (i32, i32, i32) {
    %c0_i32 = arith.constant 0 : i32
    %c0_i32_0 = arith.constant 0 : i32
    %c0_i32_1 = arith.constant 0 : i32
    return %c0_i32, %arg0, %c0_i32_0 : i32, i32, i32
  }
  func.func @transform_1(%arg0: i32) -> (i32, i32) {
    %c0_i32 = arith.constant 0 : i32
    %c0_i32_0 = arith.constant 0 : i32
    return %arg0, %c0_i32 : i32, i32
  }
  func.func @transform_2(%arg0: i32) -> (i32, i32) {
    %c0_i32 = arith.constant 0 : i32
    %c0_i32_0 = arith.constant 0 : i32
    return %arg0, %c0_i32 : i32, i32
  }
  func.func @transform_3(%arg0: i32) -> (i32, i32) {
    %c0_i32 = arith.constant 0 : i32
    %c0_i32_0 = arith.constant 0 : i32
    %c0_i32_1 = arith.constant 0 : i32
    return %c0_i32, %c0_i32_0 : i32, i32
  }
  func.func @transform_4(%arg0: i32) -> (i32, i32) {
    %c0_i32 = arith.constant 0 : i32
    %c0_i32_0 = arith.constant 0 : i32
    %c0_i32_1 = arith.constant 0 : i32
    return %c0_i32, %c0_i32_0 : i32, i32
  }
  func.func @transform_5(%arg0: i32) -> (i32, i32) {
    %c0_i32 = arith.constant 0 : i32
    %c0_i32_0 = arith.constant 0 : i32
    %c0_i32_1 = arith.constant 0 : i32
    return %c0_i32, %c0_i32_0 : i32, i32
  }
  func.func @transform_6(%arg0: i32) -> (i32, i32) {
    %c0_i32 = arith.constant 0 : i32
    %c0_i32_0 = arith.constant 0 : i32
    %c0_i32_1 = arith.constant 0 : i32
    return %c0_i32, %c0_i32_0 : i32, i32
  }
  func.func @transform_7(%arg0: i32) -> (i32, i32) {
    %c0_i32 = arith.constant 0 : i32
    %c0_i32_0 = arith.constant 0 : i32
    %c0_i32_1 = arith.constant 0 : i32
    return %c0_i32, %c0_i32_0 : i32, i32
  }
  func.func @transform_8(%arg0: i32) -> (i32, i32) {
    %c0_i32 = arith.constant 0 : i32
    %c0_i32_0 = arith.constant 0 : i32
    %c0_i32_1 = arith.constant 0 : i32
    return %c0_i32, %c0_i32_0 : i32, i32
  }
  func.func @transform_9(%arg0: i32) -> (i32, i32, i32) {
    %c0_i32 = arith.constant 0 : i32
    %c0_i32_0 = arith.constant 0 : i32
    %c0_i32_1 = arith.constant 0 : i32
    return %c0_i32, %arg0, %c0_i32_0 : i32, i32, i32
  }
  func.func @transform_10(%arg0: i32) -> (i32, i32) {
    %c0_i32 = arith.constant 0 : i32
    %c0_i32_0 = arith.constant 0 : i32
    return %arg0, %c0_i32 : i32, i32
  }
  func.func @transform_11(%arg0: i32) -> (i32, i32) {
    %c0_i32 = arith.constant 0 : i32
    %c0_i32_0 = arith.constant 0 : i32
    return %arg0, %c0_i32 : i32, i32
  }
}

</mosaic_0001>

<bundles_post_ra>
// kernel: tpu_custom_call.1
= control target key start
LH: loop header
LB: loop body
LE: loop exit
PB: predicated region body
PF: predicated region fallthrough
CT: control target
= control target key end

     0   :  { %17 = vsyncpa [#allocation3], 0  ;;  %s3600_s0 = inlined_call_operand.hbm [shape: f32[8,8,8], index: 0, kind: input, shape index: {}]   ;;  %s3601_s1 = inlined_call_operand.hbm [shape: f32[8,32], index: 1, kind: input, shape index: {}]   ;;  %s3602_s2 = inlined_call_operand.hbm [shape: f32[8,32], index: 2, kind: input, shape index: {}]   ;;  %s3603_s3 = inlined_call_operand.vmem [shape: f32[8,32], index: 3, kind: input, shape index: {}]   ;;  %s3604_s4 = inlined_call_operand.vmem [shape: f32[1,32], index: 4, kind: input, shape index: {}]   ;;  %s3605_s5 = inlined_call_operand.hbm [shape: f32[64,128], index: 5, kind: input, shape index: {}]   ;;  %s3606_s6 = inlined_call_operand.vmem [shape: f32[1,128], index: 6, kind: input, shape index: {}]   ;;  %s3607_s7 = inlined_call_operand.hbm [shape: f32[32,128], index: 7, kind: input, shape index: {}]   ;;  %s3608_s8 = inlined_call_operand.vmem [shape: f32[1,128], index: 8, kind: input, shape index: {}]   ;;  %s3609_s9 = inlined_call_operand.hbm [shape: f32[8,8,128], index: 9, kind: output, shape index: {0}]   ;;  %s3610_s10 = inlined_call_operand.hbm [shape: f32[8,32], index: 10, kind: output, shape index: {1}]   ;;  %s3611_s11 = inlined_call_operand.hbm [shape: f32[8,32], index: 11, kind: output, shape index: {2}]  }
   0x1   :  { %18 = vsyncpa [#allocation6], 0 }
   0x2   :  { %19 = vsyncpa [#allocation9], 0 }
   0x3   :  { %20 = vsyncpa [#allocation4], 0 }
   0x4   :  { %21 = vsyncpa [#allocation13], 0  ;;  %s3121_s17 = smov [#allocation5]   ;;  %s2935_s21 = scalar_lea.hbm %s3601_s1, 128 }
   0x5   :  { %s40_s18 = sshll.u32 %s3121_s17, 4  ;;  %p2936_p0 = scmp.ne.s32.totalorder %s3601_s1, %s2935_s21  ;;  %s41_s18 = int_to_ptr.vmem [resolvable:$true] %s40_s18 }
   0x6   :  { %p2939_p1 = scmp.lt.u32.totalorder %s2935_s21, %s3601_s1 }
   0x8   :  { %p2941_p2 = pnand %p2939_p1, %p2936_p0 }
   0xa   :  { %2944 = shalt.err (!%p2941_p2)
}
   0xb   :  { %s2945_s26 = scalar_lea.vmem %s41_s18, 128  ;;  %p2950_p4 = scmp.lt.s32.totalorder %s41_s18, %s41_s18 }
   0xc   :  { %p2946_p3 = scmp.ne.s32.totalorder %s41_s18, %s2945_s26  ;;  %p2951_p5 = scmp.lt.s32.totalorder %s2945_s26, %s2945_s26 }
   0xe   :  { %p2952_p6 = por %p2951_p5, %p2950_p4 }
  0x10   :  { %p2953_p7 = pnand %p2952_p6, %p2946_p3 }
  0x12   :  { %2956 = shalt.err (!%p2953_p7)
}
  0x13   :  { %43 = dma.hbm_to_vmem [thread:$0]  %s3601_s1, 128, %s41_s18, [#allocation6]  }
  0x14   :  { %s3122_s29 = smov [#allocation8]   ;;  %s3123_s12 = smov [#allocation2]  }
  0x15   :  { %s63_s30 = sshll.u32 %s3122_s29, 4  ;;  %s27_s13 = sshll.u32 %s3123_s12, 4  ;;  %s64_s30 = int_to_ptr.vmem [resolvable:$true] %s63_s30  ;;  %s28_s13 = int_to_ptr.vmem [resolvable:$true] %s27_s13 }
  0x16   :  { %s2957_s16 = scalar_lea.hbm %s3605_s5, 1024 }
  0x17   :  { %p2958_p8 = scmp.ne.s32.totalorder %s3605_s5, %s2957_s16  ;;  %p2961_p9 = scmp.lt.u32.totalorder %s2957_s16, %s3605_s5 }
  0x19   :  { %p2963_p10 = pnand %p2961_p9, %p2958_p8 }
  0x1b   :  { %2966 = shalt.err (!%p2963_p10)
}
  0x1c   :  { %s2967_s1 = scalar_lea.vmem %s64_s30, 1024  ;;  %p2972_p12 = scmp.lt.s32.totalorder %s64_s30, %s64_s30 }
  0x1d   :  { %p2968_p11 = scmp.ne.s32.totalorder %s64_s30, %s2967_s1  ;;  %p2973_p13 = scmp.lt.s32.totalorder %s2967_s1, %s2967_s1 }
  0x1f   :  { %p2974_p0 = por %p2973_p13, %p2972_p12 }
  0x21   :  { %p2975_p1 = pnand %p2974_p0, %p2968_p11 }
  0x23   :  { %2978 = shalt.err (!%p2975_p1)
}
  0x24   :  { %s3124_s18 = smov 128   ;;  %s3125_s22 = smov 8  }
  0x25   :  { %69 = dma.hbm_to_vmem [thread:$0]  %s3605_s5, 1024, %s64_s30, [#allocation9], %s3124_s18, %s3124_s18, %s3125_s22  }
  0x26   :  { %s2979_s27 = scalar_lea.hbm %s3600_s0, 1024 }
  0x27   :  { %p2980_p2 = scmp.ne.s32.totalorder %s3600_s0, %s2979_s27  ;;  %p2983_p3 = scmp.lt.u32.totalorder %s2979_s27, %s3600_s0 }
  0x29   :  { %p2985_p4 = pnand %p2983_p3, %p2980_p2 }
  0x2b   :  { %2988 = shalt.err (!%p2985_p4)
}
  0x2c   :  { %s2989_s15 = scalar_lea.vmem %s28_s13, 1024  ;;  %p2994_p6 = scmp.lt.s32.totalorder %s28_s13, %s28_s13 }
  0x2d   :  { %p2990_p5 = scmp.ne.s32.totalorder %s28_s13, %s2989_s15  ;;  %p2995_p7 = scmp.lt.s32.totalorder %s2989_s15, %s2989_s15 }
  0x2f   :  { %p2996_p8 = por %p2995_p7, %p2994_p6 }
  0x31   :  { %p2997_p9 = pnand %p2996_p8, %p2990_p5 }
  0x33   :  { %3000 = shalt.err (!%p2997_p9)
}
  0x34   :  { %33 = dma.hbm_to_vmem [thread:$0]  %s3600_s0, 1024, %s28_s13, [#allocation3], %s3124_s18, %s3124_s18, %s3125_s22  }
  0x35   :  { %s3126_s16 = smov [#allocation7]   ;;  %s3127_s19 = smov [#allocation10]  }
  0x36   :  { %s50_s17 = sshll.u32 %s3126_s16, 4  ;;  %s77_s20 = sshll.u32 %s3127_s19, 4  ;;  %s51_s17 = int_to_ptr.vmem [resolvable:$true] %s50_s17  ;;  %s78_s20 = int_to_ptr.vmem [resolvable:$true] %s77_s20 }
  0x37   :  { %s3001_s23 = scalar_lea.hbm %s3602_s2, 128 }
  0x38   :  { %p3002_p10 = scmp.ne.s32.totalorder %s3602_s2, %s3001_s23  ;;  %p3005_p11 = scmp.lt.u32.totalorder %s3001_s23, %s3602_s2 }
  0x3a   :  { %p3007_p12 = pnand %p3005_p11, %p3002_p10 }
  0x3c   :  { %3010 = shalt.err (!%p3007_p12)
}
  0x3d   :  { %s3011_s0 = scalar_lea.vmem %s51_s17, 128  ;;  %p3016_p0 = scmp.lt.s32.totalorder %s51_s17, %s51_s17 }
  0x3e   :  { %p3012_p13 = scmp.ne.s32.totalorder %s51_s17, %s3011_s0  ;;  %p3017_p1 = scmp.lt.s32.totalorder %s3011_s0, %s3011_s0 }
  0x40   :  { %p3018_p2 = por %p3017_p1, %p3016_p0 }
  0x42   :  { %p3019_p3 = pnand %p3018_p2, %p3012_p13 }
  0x44   :  { %3022 = shalt.err (!%p3019_p3)
}
  0x45   :  { %53 = dma.hbm_to_vmem [thread:$0]  %s3602_s2, 128, %s51_s17, [#allocation6]  }
  0x46   :  { %s3023_s14 = scalar_lea.hbm %s3607_s7, 512 }
  0x47   :  { %p3024_p4 = scmp.ne.s32.totalorder %s3607_s7, %s3023_s14  ;;  %p3027_p5 = scmp.lt.u32.totalorder %s3023_s14, %s3607_s7 }
  0x49   :  { %p3029_p6 = pnand %p3027_p5, %p3024_p4 }
  0x4b   :  { %3032 = shalt.err (!%p3029_p6)
}
  0x4c   :  { %s3033_s19 = scalar_lea.vmem %s78_s20, 512  ;;  %p3038_p8 = scmp.lt.s32.totalorder %s78_s20, %s78_s20 }
  0x4d   :  { %p3034_p7 = scmp.ne.s32.totalorder %s78_s20, %s3033_s19  ;;  %p3039_p9 = scmp.lt.s32.totalorder %s3033_s19, %s3033_s19 }
  0x4f   :  { %p3040_p10 = por %p3039_p9, %p3038_p8 }
  0x51   :  { %p3041_p11 = pnand %p3040_p10, %p3034_p7 }
  0x53   :  { %3044 = shalt.err (!%p3041_p11)
}
  0x54   :  { %83 = dma.hbm_to_vmem [thread:$0]  %s3607_s7, 512, %s78_s20, [#allocation9], %s3124_s18, %s3124_s18, %s3125_s22  }
  0x55   :  { %3111 = dma.done.wait [#allocation3], 1024  }
  0x56   :  { %3112 = vsyncadd [#allocation3], 4294966272 }
  0x57   :  { %3113 = dma.done.wait [#allocation6], 256  }
  0x58   :  { %3114 = vsyncadd [#allocation6], 4294967040 }
  0x59   :  { %3115 = dma.done.wait [#allocation9], 1536  }
  0x5a   :  { %3116 = vsyncadd [#allocation9], 4294965760  ;;  %v3128_v0 = vmov 0.0   ;;  %vm3129_vm0 = vmmov 0   ;;  %v3130_v1 = vmov 0.0|0.0   ;;  %vm138_vm1 = vcmask 64512  }
  0x5b   :  { %2399 = vmatprep.subr.mxu1 %v3128_v0  ;;  %2401 = vmatprep.mubr.msk.f32.mxu1 %vm3129_vm0, %v3128_v0  ;;  %v3275_v2 = vld [vmem:[%s3603_s3] sm:$0xff]  ;;  %s3131_s21 = smov 32   ;;  %v102_v5 = vld [vmem:[#allocation8] sm:$0xff]  ;;  %v103_v6 = vld [vmem:[#allocation8 + $0x8] sm:$0xff]  ;;  %vm217_vm2 = vcmask 261120   ;;  %vm219_vm3 = vcmask 523264  }
  0x5c   :  { %2691 = vmatprep.subr.bf16.mxu0 %v3130_v1  ;;  %2431 = vmatprep.mubr.msk.f32.mxu0 %vm3129_vm0, %v3128_v0  ;;  %v137_v3 = vld [vmem:[#allocation2] sm:$0xff]  ;;  %v3283_v7 = vpack.c.bf16 %v103_v6, %v102_v5  ;;  %v105_v9 = vld [vmem:[#allocation8 + $0x18] sm:$0xff]  ;;  %v106_v11 = vld [vmem:[#allocation8 + $0x20] sm:$0xff]  ;;  %s3134_s26 = smov [#allocation12]  }
  0x5d   :  { %v135_v4 = vld [vmem:[#allocation5] sm:$0xff]  ;;  %2400 = vmatpush3.msra.mxu1 %v3275_v2  ;;  %v107_v12 = vld [vmem:[#allocation8 + $0x28] sm:$0xff]  ;;  %v109_v15 = vld [vmem:[#allocation8 + $0x38] sm:$0xff]  ;;  %s2208_s27 = sshll.u32 %s3134_s26, 4  ;;  %s2209_s27 = int_to_ptr.vmem [resolvable:$true] %s2208_s27 }
  0x5e   :  { %214 = vrot.lane.b32.xlu0 %v135_v4, %s3131_s21  ;;  %2402 = vmatmul.mubr.msk.f32.vlgmr.msra.gmra.mrb[0].mxu1 %vm138_vm1, %v137_v3  ;;  %v104_v8 = vld [vmem:[#allocation8 + $0x10] sm:$0xff]  ;;  %v3290_v13 = vpack.c.bf16 %v107_v12, %v106_v11  ;;  %v136_v17 = vld [vmem:[#allocation7] sm:$0xff]  ;;  %v110_v40 = vld [vmem:[#allocation10] sm:$0xff]  ;;  %s3045_s0 = scalar_lea.vmem %s2209_s27, 128  ;;  %p3050_p13 = scmp.lt.s32.totalorder %s2209_s27, %s2209_s27 }
  0x5f   :  { %2679 = vmatprep.subr.bf16.mxu1 %v3130_v1  ;;  %2420 = vmatprep.mubr.msk.f32.mxu1 %vm3129_vm0, %v3128_v0  ;;  %v3287_v10 = vpack.c.bf16 %v105_v9, %v104_v8  ;;  %v108_v14 = vld [vmem:[#allocation8 + $0x30] sm:$0xff]  ;;  %v111_v41 = vld [vmem:[#allocation10 + $0x8] sm:$0xff]  ;;  %v113_v44 = vld [vmem:[#allocation10 + $0x18] sm:$0xff]  ;;  %p3046_p12 = scmp.ne.s32.totalorder %s2209_s27, %s3045_s0  ;;  %p3051_p0 = scmp.lt.s32.totalorder %s3045_s0, %s3045_s0 }
  0x60   :  { %2681 = vmatpush3.bf16.msra.mxu1 %v3283_v7  ;;  %v3294_v16 = vpack.c.bf16 %v109_v15, %v108_v14  ;;  %301 = vrot.lane.b32.xlu1 %v136_v17, %s3131_s21  ;;  %v3303_v18 = vld [vmem:[%s3604_s4] ss:$0 sm:$0xff]  ;;  %s3132_s4 = smov 64   ;;  %v3321_v43 = vpack.c.bf16 %v111_v41, %v110_v40  ;;  %v399_v50 = vld [vmem:[#allocation2 + $0x8] sm:$0xff] }
  0x61   :  { %2682 = vmatprep.subr.bf16.mxu1 %v3130_v1  ;;  %v3313_v25 = vld [vmem:[%s3606_s6] ss:$0 sm:$0xff]  ;;  %p3052_p1 = por %p3051_p0, %p3050_p13 }
  0x62   :  { %v112_v42 = vld [vmem:[#allocation10 + $0x10] sm:$0xff]  ;;  %2693 = vmatpush3.bf16.msra.mxu0 %v3321_v43 }
  0x63   :  { %v3324_v45 = vpack.c.bf16 %v113_v44, %v112_v42  ;;  %2694 = vmatprep.subr.bf16.mxu0 %v3130_v1  ;;  %v3355_v51 = vld [vmem:[%s3608_s8] ss:$0 sm:$0xff]  ;;  %s3133_s8 = smov 96   ;;  %p3053_p2 = pnand %p3052_p1, %p3046_p12 }
  0x64   :  { %2684 = vmatpush3.bf16.msra.mxu1 %v3287_v10 }
  0x65   :  { %2685 = vmatprep.subr.bf16.mxu1 %v3130_v1 }
  0x66   :  { %2696 = vmatpush3.bf16.msra.mxu0 %v3324_v45 }
  0x67   :  { %2434 = vmatprep.subr.mxu0 %v3128_v0 }
  0x68   :  { %2687 = vmatpush3.bf16.msra.mxu1 %v3290_v13 }
  0x69   :  { %2688 = vmatprep.subr.bf16.mxu1 %v3130_v1 }
  0x6c   :  { %2690 = vmatpush3.bf16.msra.mxu1 %v3294_v16 }
  0x6d   :  { %2709 = vmatprep.subr.bf16.mxu1 %v3130_v1 }
  0xd0   :  { %v215_v22 = vpop.permute.xlu0 %214 }
  0xd2   :  { %v302_v36 = vpop.permute.xlu1 %301 }
 0x131   :  { %v208_v19 = vpop.f32.mrb[0].mxu1 }
 0x132   :  { %v209_v20 = vadd.f32 %v3303_v18, %v208_v19  ;;  %v2403_v21 = vpop.f32.mrb[1].mxu1 }
 0x134   :  { %2839 = vtanh.f32 %v209_v20 }
 0x13e   :  { %v2840_v23 = vpop.eup %2839 }
 0x13f   :  { %v218_v24 = vsel %vm217_vm2, %v2840_v23, %v215_v22  ;;  %v654_v23 = vld [vmem:[#allocation2 + $0x10] sm:$0xff] }
 0x140   :  { %2421 = vmatmul.mubr.msk.f32.vlgmr.msra.gmra.mrb[2].mxu1 %vm219_vm3, %v218_v24 }
 0x141   :  { %2466 = vmatprep.mubr.msk.f32.mxu1 %vm3129_vm0, %v3128_v0  ;;  %2711 = vmatpush3.bf16.msra.mxu1 %v3321_v43 }
 0x142   :  { %2712 = vmatprep.subr.bf16.mxu1 %v3130_v1 }
 0x145   :  { %2714 = vmatpush3.bf16.msra.mxu1 %v3324_v45 }
 0x146   :  { %2469 = vmatprep.subr.mxu1 %v3128_v0 }
 0x213   :  { %v289_v26 = vpop.f32.mrb[2].mxu1 }
 0x214   :  { %v290_v27 = vadd.f32 %v3313_v25, %v289_v26  ;;  %v2422_v28 = vpop.f32.mrb[3].mxu1 }
 0x216   :  { %2841 = vtanh.f32 %v290_v27  ;;  %v2241_v30 = vmul.f32 -1.442695, %v290_v27 }
 0x218   :  { %2843 = vpow2.f32 %v2241_v30 }
 0x220   :  { %v2842_v29 = vpop.eup %2841 }
 0x221   :  { %306 = vrot.lane.b32.xlu0 %v2842_v29, %s3132_s4 }
 0x222   :  { %v2844_v31 = vpop.eup %2843 }
 0x223   :  { %v296_v32 = vadd.f32 1.0, %v2844_v31 }
 0x225   :  { %2845 = vrcp.f32 %v296_v32 }
 0x22f   :  { %v2846_v33 = vpop.eup %2845 }
 0x230   :  { %v304_v37 = vmul.f32 %v2846_v33, %v302_v36 }
 0x293   :  { %v307_v34 = vpop.permute.xlu0 %306 }
 0x294   :  { %v309_v35 = vmul.f32 %v2846_v33, %v307_v34 }
 0x296   :  { %311 = vrot.lane.b32.xlu1 %v309_v35, %s3131_s21 }
 0x308   :  { %v312_v38 = vpop.permute.xlu1 %311 }
 0x309   :  { %v3318_v39 = vadd.f32 %v312_v38, %v304_v37 }
 0x30b   :  { %2847 = vtanh.f32 %v3318_v39 }
 0x315   :  { %v2848_v46 = vpop.eup %2847 }
 0x316   :  { %317 = vrot.lane.b32.xlu0 %v2848_v46, %s3132_s4 }
 0x388   :  { %v318_v47 = vpop.permute.xlu0 %317 }
 0x389   :  { %v320_v48 = vmul.f32 %v2846_v33, %v318_v47 }
 0x38b   :  { %474 = vrot.lane.b32.xlu0 %v320_v48, %s3132_s4  ;;  %322 = vrot.lane.b32.xlu1 %v320_v48, %s3131_s21 }
 0x3fd   :  { %v323_v49 = vpop.permute.xlu1 %322  ;;  %v475_v60 = vpop.permute.xlu0 %474 }
 0x3fe   :  { %2432 = vmatmul.mubr.msk.f32.vlgmr.msra.gmra.mrb[0].mxu0 %vm217_vm2, %v323_v49 }
 0x3ff   :  { %2435 = vmatpush3.msra.mxu0 %v3275_v2  ;;  %2436 = vmatprep.mubr.msk.f32.mxu0 %vm3129_vm0, %v3128_v0 }
 0x400   :  { %2697 = vmatprep.subr.bf16.mxu0 %v3130_v1 }
 0x402   :  { %2437 = vmatmul.mubr.msk.f32.vlgmr.msra.gmra.mrb[2].mxu0 %vm138_vm1, %v399_v50 }
 0x403   :  { %2699 = vmatpush3.bf16.msra.mxu0 %v3283_v7  ;;  %2455 = vmatprep.mubr.msk.f32.mxu0 %vm3129_vm0, %v3128_v0 }
 0x404   :  { %2700 = vmatprep.subr.bf16.mxu0 %v3130_v1 }
 0x407   :  { %2702 = vmatpush3.bf16.msra.mxu0 %v3287_v10 }
 0x408   :  { %2703 = vmatprep.subr.bf16.mxu0 %v3130_v1 }
 0x40b   :  { %2705 = vmatpush3.bf16.msra.mxu0 %v3290_v13 }
 0x40c   :  { %2706 = vmatprep.subr.bf16.mxu0 %v3130_v1 }
 0x40f   :  { %2708 = vmatpush3.bf16.msra.mxu0 %v3294_v16 }
 0x410   :  { %2727 = vmatprep.subr.bf16.mxu0 %v3130_v1 }
 0x4d1   :  { %v392_v52 = vpop.f32.mrb[0].mxu0 }
 0x4d2   :  { %v393_v53 = vadd.f32 %v3355_v51, %v392_v52  ;;  %v2433_v54 = vpop.f32.mrb[1].mxu0 }
 0x4d4   :  { %2849 = vtanh.f32 %v393_v53 }
 0x4d5   :  { %v469_v55 = vpop.f32.mrb[2].mxu0 }
 0x4d6   :  { %v470_v56 = vadd.f32 %v3303_v18, %v469_v55  ;;  %v2438_v57 = vpop.f32.mrb[3].mxu0  ;;  %v909_v55 = vld [vmem:[#allocation2 + $0x18] sm:$0xff] }
 0x4d8   :  { %2851 = vtanh.f32 %v470_v56 }
 0x4de   :  { %v2850_v58 = vpop.eup %2849 }
 0x4df   :  { %397 = vst [vmem:[#allocation11] sm:$0xff] %v2850_v58 }
 0x4e2   :  { %v2852_v59 = vpop.eup %2851 }
 0x4e3   :  { %v477_v61 = vsel %vm217_vm2, %v2852_v59, %v475_v60 }
 0x4e4   :  { %2456 = vmatmul.mubr.msk.f32.vlgmr.msra.gmra.mrb[4].mxu0 %vm219_vm3, %v477_v61 }
 0x4e5   :  { %2729 = vmatpush3.bf16.msra.mxu0 %v3321_v43  ;;  %2501 = vmatprep.mubr.msk.f32.mxu0 %vm3129_vm0, %v3128_v0 }
 0x4e6   :  { %2730 = vmatprep.subr.bf16.mxu0 %v3130_v1 }
 0x4e9   :  { %2732 = vmatpush3.bf16.msra.mxu0 %v3324_v45 }
 0x4ea   :  { %2504 = vmatprep.subr.mxu0 %v3128_v0 }
 0x5b7   :  { %v547_v62 = vpop.f32.mrb[4].mxu0 }
 0x5b8   :  { %v548_v63 = vadd.f32 %v3313_v25, %v547_v62  ;;  %v2457_v3 = vpop.f32.mrb[5].mxu0 }
 0x5ba   :  { %2853 = vtanh.f32 %v548_v63  ;;  %v2245_v5 = vmul.f32 -1.442695, %v548_v63 }
 0x5bc   :  { %2855 = vpow2.f32 %v2245_v5 }
 0x5c4   :  { %v2854_v4 = vpop.eup %2853 }
 0x5c5   :  { %560 = vrot.lane.b32.xlu1 %v2854_v4, %s3132_s4 }
 0x5c6   :  { %v2856_v6 = vpop.eup %2855 }
 0x5c7   :  { %v554_v8 = vadd.f32 1.0, %v2856_v6 }
 0x5c9   :  { %2857 = vrcp.f32 %v554_v8 }
 0x5d3   :  { %v2858_v9 = vpop.eup %2857 }
 0x5d4   :  { %v558_v14 = vmul.f32 %v2858_v9, %v3318_v39 }
 0x637   :  { %v561_v11 = vpop.permute.xlu1 %560 }
 0x638   :  { %v563_v12 = vmul.f32 %v2858_v9, %v561_v11 }
 0x63a   :  { %565 = vrot.lane.b32.xlu0 %v563_v12, %s3131_s21 }
 0x6ac   :  { %v566_v15 = vpop.permute.xlu0 %565 }
 0x6ad   :  { %v568_v17 = vadd.f32 %v566_v15, %v558_v14 }
 0x6af   :  { %2859 = vtanh.f32 %v568_v17 }
 0x6b9   :  { %v2860_v19 = vpop.eup %2859 }
 0x6ba   :  { %571 = vrot.lane.b32.xlu1 %v2860_v19, %s3132_s4 }
 0x72c   :  { %v572_v20 = vpop.permute.xlu1 %571 }
 0x72d   :  { %v574_v21 = vmul.f32 %v2858_v9, %v572_v20 }
 0x72f   :  { %729 = vrot.lane.b32.xlu1 %v574_v21, %s3132_s4  ;;  %576 = vrot.lane.b32.xlu0 %v574_v21, %s3131_s21 }
 0x7a1   :  { %v577_v22 = vpop.permute.xlu0 %576  ;;  %v730_v33 = vpop.permute.xlu1 %729 }
 0x7a2   :  { %2467 = vmatmul.mubr.msk.f32.vlgmr.msra.gmra.mrb[4].mxu1 %vm217_vm2, %v577_v22 }
 0x7a3   :  { %2470 = vmatpush3.msra.mxu1 %v3275_v2  ;;  %2471 = vmatprep.mubr.msk.f32.mxu1 %vm3129_vm0, %v3128_v0 }
 0x7a4   :  { %2715 = vmatprep.subr.bf16.mxu1 %v3130_v1 }
 0x7a6   :  { %2472 = vmatmul.mubr.msk.f32.vlgmr.msra.gmra.mrb[6].mxu1 %vm138_vm1, %v654_v23 }
 0x7a7   :  { %2717 = vmatpush3.bf16.msra.mxu1 %v3283_v7  ;;  %2490 = vmatprep.mubr.msk.f32.mxu1 %vm3129_vm0, %v3128_v0 }
 0x7a8   :  { %2718 = vmatprep.subr.bf16.mxu1 %v3130_v1 }
 0x7ab   :  { %2720 = vmatpush3.bf16.msra.mxu1 %v3287_v10 }
 0x7ac   :  { %2721 = vmatprep.subr.bf16.mxu1 %v3130_v1 }
 0x7af   :  { %2723 = vmatpush3.bf16.msra.mxu1 %v3290_v13 }
 0x7b0   :  { %2724 = vmatprep.subr.bf16.mxu1 %v3130_v1 }
 0x7b3   :  { %2726 = vmatpush3.bf16.msra.mxu1 %v3294_v16 }
 0x7b4   :  { %2745 = vmatprep.subr.bf16.mxu1 %v3130_v1 }
 0x875   :  { %v646_v24 = vpop.f32.mrb[4].mxu1 }
 0x876   :  { %v647_v26 = vadd.f32 %v3355_v51, %v646_v24  ;;  %v2468_v27 = vpop.f32.mrb[5].mxu1 }
 0x878   :  { %2861 = vtanh.f32 %v647_v26 }
 0x879   :  { %v724_v28 = vpop.f32.mrb[6].mxu1 }
 0x87a   :  { %v725_v29 = vadd.f32 %v3303_v18, %v724_v28  ;;  %v2473_v30 = vpop.f32.mrb[7].mxu1  ;;  %v1164_v28 = vld [vmem:[#allocation2 + $0x20] sm:$0xff] }
 0x87c   :  { %2863 = vtanh.f32 %v725_v29 }
 0x882   :  { %v2862_v31 = vpop.eup %2861 }
 0x883   :  { %652 = vst [vmem:[#allocation11 + $0x8] sm:$0xff] %v2862_v31 }
 0x886   :  { %v2864_v32 = vpop.eup %2863 }
 0x887   :  { %v732_v34 = vsel %vm217_vm2, %v2864_v32, %v730_v33 }
 0x888   :  { %2491 = vmatmul.mubr.msk.f32.vlgmr.msra.gmra.mrb[8].mxu1 %vm219_vm3, %v732_v34 }
 0x889   :  { %2747 = vmatpush3.bf16.msra.mxu1 %v3321_v43  ;;  %2536 = vmatprep.mubr.msk.f32.mxu1 %vm3129_vm0, %v3128_v0 }
 0x88a   :  { %2748 = vmatprep.subr.bf16.mxu1 %v3130_v1 }
 0x88d   :  { %2750 = vmatpush3.bf16.msra.mxu1 %v3324_v45 }
 0x88e   :  { %2539 = vmatprep.subr.mxu1 %v3128_v0 }
 0x95b   :  { %v802_v35 = vpop.f32.mrb[8].mxu1 }
 0x95c   :  { %v803_v36 = vadd.f32 %v3313_v25, %v802_v35  ;;  %v2492_v37 = vpop.f32.mrb[9].mxu1 }
 0x95e   :  { %2865 = vtanh.f32 %v803_v36  ;;  %v2249_v39 = vmul.f32 -1.442695, %v803_v36 }
 0x960   :  { %2867 = vpow2.f32 %v2249_v39 }
 0x968   :  { %v2866_v38 = vpop.eup %2865 }
 0x969   :  { %815 = vrot.lane.b32.xlu0 %v2866_v38, %s3132_s4 }
 0x96a   :  { %v2868_v40 = vpop.eup %2867 }
 0x96b   :  { %v809_v41 = vadd.f32 1.0, %v2868_v40 }
 0x96d   :  { %2869 = vrcp.f32 %v809_v41 }
 0x977   :  { %v2870_v42 = vpop.eup %2869 }
 0x978   :  { %v813_v47 = vmul.f32 %v2870_v42, %v568_v17 }
 0x9db   :  { %v816_v44 = vpop.permute.xlu0 %815 }
 0x9dc   :  { %v818_v46 = vmul.f32 %v2870_v42, %v816_v44 }
 0x9de   :  { %820 = vrot.lane.b32.xlu1 %v818_v46, %s3131_s21 }
 0xa50   :  { %v821_v48 = vpop.permute.xlu1 %820 }
 0xa51   :  { %v823_v49 = vadd.f32 %v821_v48, %v813_v47 }
 0xa53   :  { %2871 = vtanh.f32 %v823_v49 }
 0xa5d   :  { %v2872_v50 = vpop.eup %2871 }
 0xa5e   :  { %826 = vrot.lane.b32.xlu0 %v2872_v50, %s3132_s4 }
 0xad0   :  { %v827_v52 = vpop.permute.xlu0 %826 }
 0xad1   :  { %v829_v53 = vmul.f32 %v2870_v42, %v827_v52 }
 0xad3   :  { %984 = vrot.lane.b32.xlu0 %v829_v53, %s3132_s4  ;;  %831 = vrot.lane.b32.xlu1 %v829_v53, %s3131_s21 }
 0xb45   :  { %v832_v54 = vpop.permute.xlu1 %831  ;;  %v985_v3 = vpop.permute.xlu0 %984 }
 0xb46   :  { %2502 = vmatmul.mubr.msk.f32.vlgmr.msra.gmra.mrb[6].mxu0 %vm217_vm2, %v832_v54 }
 0xb47   :  { %2505 = vmatpush3.msra.mxu0 %v3275_v2  ;;  %2506 = vmatprep.mubr.msk.f32.mxu0 %vm3129_vm0, %v3128_v0 }
 0xb48   :  { %2733 = vmatprep.subr.bf16.mxu0 %v3130_v1 }
 0xb4a   :  { %2507 = vmatmul.mubr.msk.f32.vlgmr.msra.gmra.mrb[8].mxu0 %vm138_vm1, %v909_v55 }
 0xb4b   :  { %2735 = vmatpush3.bf16.msra.mxu0 %v3283_v7  ;;  %2525 = vmatprep.mubr.msk.f32.mxu0 %vm3129_vm0, %v3128_v0 }
 0xb4c   :  { %2736 = vmatprep.subr.bf16.mxu0 %v3130_v1 }
 0xb4f   :  { %2738 = vmatpush3.bf16.msra.mxu0 %v3287_v10 }
 0xb50   :  { %2739 = vmatprep.subr.bf16.mxu0 %v3130_v1 }
 0xb53   :  { %2741 = vmatpush3.bf16.msra.mxu0 %v3290_v13 }
 0xb54   :  { %2742 = vmatprep.subr.bf16.mxu0 %v3130_v1 }
 0xb57   :  { %2744 = vmatpush3.bf16.msra.mxu0 %v3294_v16 }
 0xb58   :  { %2763 = vmatprep.subr.bf16.mxu0 %v3130_v1 }
 0xc19   :  { %v901_v56 = vpop.f32.mrb[6].mxu0 }
 0xc1a   :  { %v902_v57 = vadd.f32 %v3355_v51, %v901_v56  ;;  %v2503_v58 = vpop.f32.mrb[7].mxu0 }
 0xc1c   :  { %2873 = vtanh.f32 %v902_v57 }
 0xc1d   :  { %v979_v59 = vpop.f32.mrb[8].mxu0 }
 0xc1e   :  { %v980_v60 = vadd.f32 %v3303_v18, %v979_v59  ;;  %v2508_v61 = vpop.f32.mrb[9].mxu0  ;;  %v1419_v59 = vld [vmem:[#allocation2 + $0x28] sm:$0xff] }
 0xc20   :  { %2875 = vtanh.f32 %v980_v60 }
 0xc26   :  { %v2874_v62 = vpop.eup %2873 }
 0xc27   :  { %907 = vst [vmem:[#allocation11 + $0x10] sm:$0xff] %v2874_v62 }
 0xc2a   :  { %v2876_v63 = vpop.eup %2875 }
 0xc2b   :  { %v987_v4 = vsel %vm217_vm2, %v2876_v63, %v985_v3 }
 0xc2c   :  { %2526 = vmatmul.mubr.msk.f32.vlgmr.msra.gmra.mrb[10].mxu0 %vm219_vm3, %v987_v4 }
 0xc2d   :  { %2765 = vmatpush3.bf16.msra.mxu0 %v3321_v43  ;;  %2571 = vmatprep.mubr.msk.f32.mxu0 %vm3129_vm0, %v3128_v0 }
 0xc2e   :  { %2766 = vmatprep.subr.bf16.mxu0 %v3130_v1 }
 0xc31   :  { %2768 = vmatpush3.bf16.msra.mxu0 %v3324_v45 }
 0xc32   :  { %2574 = vmatprep.subr.mxu0 %v3128_v0 }
 0xcff   :  { %v1057_v5 = vpop.f32.mrb[10].mxu0 }
 0xd00   :  { %v1058_v6 = vadd.f32 %v3313_v25, %v1057_v5  ;;  %v2527_v8 = vpop.f32.mrb[11].mxu0 }
 0xd02   :  { %2877 = vtanh.f32 %v1058_v6  ;;  %v2253_v11 = vmul.f32 -1.442695, %v1058_v6 }
 0xd04   :  { %2879 = vpow2.f32 %v2253_v11 }
 0xd0c   :  { %v2878_v9 = vpop.eup %2877 }
 0xd0d   :  { %1070 = vrot.lane.b32.xlu1 %v2878_v9, %s3132_s4 }
 0xd0e   :  { %v2880_v12 = vpop.eup %2879 }
 0xd0f   :  { %v1064_v14 = vadd.f32 1.0, %v2880_v12 }
 0xd11   :  { %2881 = vrcp.f32 %v1064_v14 }
 0xd1b   :  { %v2882_v15 = vpop.eup %2881 }
 0xd1c   :  { %v1068_v20 = vmul.f32 %v2882_v15, %v823_v49 }
 0xd7f   :  { %v1071_v17 = vpop.permute.xlu1 %1070 }
 0xd80   :  { %v1073_v19 = vmul.f32 %v2882_v15, %v1071_v17 }
 0xd82   :  { %1075 = vrot.lane.b32.xlu0 %v1073_v19, %s3131_s21 }
 0xdf4   :  { %v1076_v21 = vpop.permute.xlu0 %1075 }
 0xdf5   :  { %v1078_v22 = vadd.f32 %v1076_v21, %v1068_v20 }
 0xdf7   :  { %2883 = vtanh.f32 %v1078_v22 }
 0xe01   :  { %v2884_v23 = vpop.eup %2883 }
 0xe02   :  { %1081 = vrot.lane.b32.xlu1 %v2884_v23, %s3132_s4 }
 0xe74   :  { %v1082_v24 = vpop.permute.xlu1 %1081 }
 0xe75   :  { %v1084_v26 = vmul.f32 %v2882_v15, %v1082_v24 }
 0xe77   :  { %1239 = vrot.lane.b32.xlu1 %v1084_v26, %s3132_s4  ;;  %1086 = vrot.lane.b32.xlu0 %v1084_v26, %s3131_s21 }
 0xee9   :  { %v1087_v27 = vpop.permute.xlu0 %1086  ;;  %v1240_v37 = vpop.permute.xlu1 %1239 }
 0xeea   :  { %2537 = vmatmul.mubr.msk.f32.vlgmr.msra.gmra.mrb[10].mxu1 %vm217_vm2, %v1087_v27 }
 0xeeb   :  { %2540 = vmatpush3.msra.mxu1 %v3275_v2  ;;  %2541 = vmatprep.mubr.msk.f32.mxu1 %vm3129_vm0, %v3128_v0 }
 0xeec   :  { %2751 = vmatprep.subr.bf16.mxu1 %v3130_v1 }
 0xeee   :  { %2542 = vmatmul.mubr.msk.f32.vlgmr.msra.gmra.mrb[12].mxu1 %vm138_vm1, %v1164_v28 }
 0xeef   :  { %2753 = vmatpush3.bf16.msra.mxu1 %v3283_v7  ;;  %2560 = vmatprep.mubr.msk.f32.mxu1 %vm3129_vm0, %v3128_v0 }
 0xef0   :  { %2754 = vmatprep.subr.bf16.mxu1 %v3130_v1 }
 0xef3   :  { %2756 = vmatpush3.bf16.msra.mxu1 %v3287_v10 }
 0xef4   :  { %2757 = vmatprep.subr.bf16.mxu1 %v3130_v1 }
 0xef7   :  { %2759 = vmatpush3.bf16.msra.mxu1 %v3290_v13 }
 0xef8   :  { %2760 = vmatprep.subr.bf16.mxu1 %v3130_v1 }
 0xefb   :  { %2762 = vmatpush3.bf16.msra.mxu1 %v3294_v16 }
 0xefc   :  { %2781 = vmatprep.subr.bf16.mxu1 %v3130_v1 }
 0xfbd   :  { %v1156_v29 = vpop.f32.mrb[10].mxu1 }
 0xfbe   :  { %v1157_v30 = vadd.f32 %v3355_v51, %v1156_v29  ;;  %v2538_v31 = vpop.f32.mrb[11].mxu1 }
 0xfc0   :  { %2885 = vtanh.f32 %v1157_v30 }
 0xfc1   :  { %v1234_v32 = vpop.f32.mrb[12].mxu1 }
 0xfc2   :  { %v1235_v33 = vadd.f32 %v3303_v18, %v1234_v32  ;;  %v2543_v34 = vpop.f32.mrb[13].mxu1  ;;  %v1674_v32 = vld [vmem:[#allocation2 + $0x30] sm:$0xff] }
 0xfc4   :  { %2887 = vtanh.f32 %v1235_v33 }
 0xfca   :  { %v2886_v35 = vpop.eup %2885 }
 0xfcb   :  { %1162 = vst [vmem:[#allocation11 + $0x18] sm:$0xff] %v2886_v35 }
 0xfce   :  { %v2888_v36 = vpop.eup %2887 }
 0xfcf   :  { %v1242_v38 = vsel %vm217_vm2, %v2888_v36, %v1240_v37 }
 0xfd0   :  { %2561 = vmatmul.mubr.msk.f32.vlgmr.msra.gmra.mrb[14].mxu1 %vm219_vm3, %v1242_v38 }
 0xfd1   :  { %2783 = vmatpush3.bf16.msra.mxu1 %v3321_v43  ;;  %2606 = vmatprep.mubr.msk.f32.mxu1 %vm3129_vm0, %v3128_v0 }
 0xfd2   :  { %2784 = vmatprep.subr.bf16.mxu1 %v3130_v1 }
 0xfd5   :  { %2786 = vmatpush3.bf16.msra.mxu1 %v3324_v45 }
 0xfd6   :  { %2609 = vmatprep.subr.mxu1 %v3128_v0 }
0x10a3   :  { %v1312_v39 = vpop.f32.mrb[14].mxu1 }
0x10a4   :  { %v1313_v40 = vadd.f32 %v3313_v25, %v1312_v39  ;;  %v2562_v41 = vpop.f32.mrb[15].mxu1 }
0x10a6   :  { %2889 = vtanh.f32 %v1313_v40  ;;  %v2257_v44 = vmul.f32 -1.442695, %v1313_v40 }
0x10a8   :  { %2891 = vpow2.f32 %v2257_v44 }
0x10b0   :  { %v2890_v42 = vpop.eup %2889 }
0x10b1   :  { %1325 = vrot.lane.b32.xlu0 %v2890_v42, %s3132_s4 }
0x10b2   :  { %v2892_v46 = vpop.eup %2891 }
0x10b3   :  { %v1319_v47 = vadd.f32 1.0, %v2892_v46 }
0x10b5   :  { %2893 = vrcp.f32 %v1319_v47 }
0x10bf   :  { %v2894_v48 = vpop.eup %2893 }
0x10c0   :  { %v1323_v52 = vmul.f32 %v2894_v48, %v1078_v22 }
0x1123   :  { %v1326_v49 = vpop.permute.xlu0 %1325 }
0x1124   :  { %v1328_v50 = vmul.f32 %v2894_v48, %v1326_v49 }
0x1126   :  { %1330 = vrot.lane.b32.xlu1 %v1328_v50, %s3131_s21 }
0x1198   :  { %v1331_v53 = vpop.permute.xlu1 %1330 }
0x1199   :  { %v1333_v54 = vadd.f32 %v1331_v53, %v1323_v52 }
0x119b   :  { %2895 = vtanh.f32 %v1333_v54 }
0x11a5   :  { %v2896_v55 = vpop.eup %2895 }
0x11a6   :  { %1336 = vrot.lane.b32.xlu0 %v2896_v55, %s3132_s4 }
0x1218   :  { %v1337_v56 = vpop.permute.xlu0 %1336 }
0x1219   :  { %v1339_v57 = vmul.f32 %v2894_v48, %v1337_v56 }
0x121b   :  { %1494 = vrot.lane.b32.xlu0 %v1339_v57, %s3132_s4  ;;  %1341 = vrot.lane.b32.xlu1 %v1339_v57, %s3131_s21 }
0x128d   :  { %v1342_v58 = vpop.permute.xlu1 %1341  ;;  %v1495_v8 = vpop.permute.xlu0 %1494 }
0x128e   :  { %2572 = vmatmul.mubr.msk.f32.vlgmr.msra.gmra.mrb[12].mxu0 %vm217_vm2, %v1342_v58 }
0x128f   :  { %2575 = vmatpush3.msra.mxu0 %v3275_v2  ;;  %2576 = vmatprep.mubr.msk.f32.mxu0 %vm3129_vm0, %v3128_v0 }
0x1290   :  { %2769 = vmatprep.subr.bf16.mxu0 %v3130_v1 }
0x1292   :  { %2577 = vmatmul.mubr.msk.f32.vlgmr.msra.gmra.mrb[14].mxu0 %vm138_vm1, %v1419_v59 }
0x1293   :  { %2771 = vmatpush3.bf16.msra.mxu0 %v3283_v7  ;;  %2595 = vmatprep.mubr.msk.f32.mxu0 %vm3129_vm0, %v3128_v0 }
0x1294   :  { %2772 = vmatprep.subr.bf16.mxu0 %v3130_v1 }
0x1297   :  { %2774 = vmatpush3.bf16.msra.mxu0 %v3287_v10 }
0x1298   :  { %2775 = vmatprep.subr.bf16.mxu0 %v3130_v1 }
0x129b   :  { %2777 = vmatpush3.bf16.msra.mxu0 %v3290_v13 }
0x129c   :  { %2778 = vmatprep.subr.bf16.mxu0 %v3130_v1 }
0x129f   :  { %2780 = vmatpush3.bf16.msra.mxu0 %v3294_v16 }
0x12a0   :  { %2799 = vmatprep.subr.bf16.mxu0 %v3130_v1 }
0x1361   :  { %v1411_v60 = vpop.f32.mrb[12].mxu0 }
0x1362   :  { %v1412_v61 = vadd.f32 %v3355_v51, %v1411_v60  ;;  %v2573_v62 = vpop.f32.mrb[13].mxu0 }
0x1364   :  { %2897 = vtanh.f32 %v1412_v61  ;;  %v1929_v61 = vld [vmem:[#allocation2 + $0x38] sm:$0xff] }
0x1365   :  { %v1489_v63 = vpop.f32.mrb[14].mxu0 }
0x1366   :  { %v1490_v3 = vadd.f32 %v3303_v18, %v1489_v63  ;;  %v2578_v4 = vpop.f32.mrb[15].mxu0 }
0x1368   :  { %2899 = vtanh.f32 %v1490_v3 }
0x136e   :  { %v2898_v5 = vpop.eup %2897 }
0x136f   :  { %1417 = vst [vmem:[#allocation11 + $0x20] sm:$0xff] %v2898_v5 }
0x1372   :  { %v2900_v6 = vpop.eup %2899 }
0x1373   :  { %v1497_v9 = vsel %vm217_vm2, %v2900_v6, %v1495_v8 }
0x1374   :  { %2596 = vmatmul.mubr.msk.f32.vlgmr.msra.gmra.mrb[16].mxu0 %vm219_vm3, %v1497_v9 }
0x1375   :  { %2801 = vmatpush3.bf16.msra.mxu0 %v3321_v43  ;;  %2641 = vmatprep.mubr.msk.f32.mxu0 %vm3129_vm0, %v3128_v0 }
0x1376   :  { %2802 = vmatprep.subr.bf16.mxu0 %v3130_v1 }
0x1379   :  { %2804 = vmatpush3.bf16.msra.mxu0 %v3324_v45 }
0x137a   :  { %2644 = vmatprep.subr.mxu0 %v3128_v0 }
0x1447   :  { %v1567_v11 = vpop.f32.mrb[16].mxu0 }
0x1448   :  { %v1568_v12 = vadd.f32 %v3313_v25, %v1567_v11  ;;  %v2597_v14 = vpop.f32.mrb[17].mxu0 }
0x144a   :  { %2901 = vtanh.f32 %v1568_v12  ;;  %v2261_v17 = vmul.f32 -1.442695, %v1568_v12 }
0x144c   :  { %2903 = vpow2.f32 %v2261_v17 }
0x1454   :  { %v2902_v15 = vpop.eup %2901 }
0x1455   :  { %1580 = vrot.lane.b32.xlu1 %v2902_v15, %s3132_s4 }
0x1456   :  { %v2904_v19 = vpop.eup %2903 }
0x1457   :  { %v1574_v20 = vadd.f32 1.0, %v2904_v19 }
0x1459   :  { %2905 = vrcp.f32 %v1574_v20 }
0x1463   :  { %v2906_v21 = vpop.eup %2905 }
0x1464   :  { %v1578_v24 = vmul.f32 %v2906_v21, %v1333_v54 }
0x14c7   :  { %v1581_v22 = vpop.permute.xlu1 %1580 }
0x14c8   :  { %v1583_v23 = vmul.f32 %v2906_v21, %v1581_v22 }
0x14ca   :  { %1585 = vrot.lane.b32.xlu0 %v1583_v23, %s3131_s21 }
0x153c   :  { %v1586_v26 = vpop.permute.xlu0 %1585 }
0x153d   :  { %v1588_v27 = vadd.f32 %v1586_v26, %v1578_v24 }
0x153f   :  { %2907 = vtanh.f32 %v1588_v27 }
0x1549   :  { %v2908_v28 = vpop.eup %2907 }
0x154a   :  { %1591 = vrot.lane.b32.xlu1 %v2908_v28, %s3132_s4 }
0x15bc   :  { %v1592_v29 = vpop.permute.xlu1 %1591 }
0x15bd   :  { %v1594_v30 = vmul.f32 %v2906_v21, %v1592_v29 }
0x15bf   :  { %1749 = vrot.lane.b32.xlu1 %v1594_v30, %s3132_s4  ;;  %1596 = vrot.lane.b32.xlu0 %v1594_v30, %s3131_s21 }
0x1631   :  { %v1597_v31 = vpop.permute.xlu0 %1596  ;;  %v1750_v41 = vpop.permute.xlu1 %1749 }
0x1632   :  { %2607 = vmatmul.mubr.msk.f32.vlgmr.msra.gmra.mrb[16].mxu1 %vm217_vm2, %v1597_v31 }
0x1633   :  { %2610 = vmatpush3.msra.mxu1 %v3275_v2  ;;  %2611 = vmatprep.mubr.msk.f32.mxu1 %vm3129_vm0, %v3128_v0 }
0x1634   :  { %2787 = vmatprep.subr.bf16.mxu1 %v3130_v1 }
0x1636   :  { %2612 = vmatmul.mubr.msk.f32.vlgmr.msra.gmra.mrb[18].mxu1 %vm138_vm1, %v1674_v32 }
0x1637   :  { %2789 = vmatpush3.bf16.msra.mxu1 %v3283_v7  ;;  %2630 = vmatprep.mubr.msk.f32.mxu1 %vm3129_vm0, %v3128_v0 }
0x1638   :  { %2790 = vmatprep.subr.bf16.mxu1 %v3130_v1 }
0x163b   :  { %2792 = vmatpush3.bf16.msra.mxu1 %v3287_v10 }
0x163c   :  { %2793 = vmatprep.subr.bf16.mxu1 %v3130_v1 }
0x163f   :  { %2795 = vmatpush3.bf16.msra.mxu1 %v3290_v13 }
0x1640   :  { %2796 = vmatprep.subr.bf16.mxu1 %v3130_v1 }
0x1643   :  { %2798 = vmatpush3.bf16.msra.mxu1 %v3294_v16 }
0x1644   :  { %2817 = vmatprep.subr.bf16.mxu1 %v3130_v1 }
0x1705   :  { %v1666_v33 = vpop.f32.mrb[16].mxu1 }
0x1706   :  { %v1667_v34 = vadd.f32 %v3355_v51, %v1666_v33  ;;  %v2608_v35 = vpop.f32.mrb[17].mxu1 }
0x1708   :  { %2909 = vtanh.f32 %v1667_v34 }
0x1709   :  { %v1744_v36 = vpop.f32.mrb[18].mxu1 }
0x170a   :  { %v1745_v37 = vadd.f32 %v3303_v18, %v1744_v36  ;;  %v2613_v38 = vpop.f32.mrb[19].mxu1 }
0x170c   :  { %2911 = vtanh.f32 %v1745_v37 }
0x1712   :  { %v2910_v39 = vpop.eup %2909 }
0x1713   :  { %1672 = vst [vmem:[#allocation11 + $0x28] sm:$0xff] %v2910_v39 }
0x1716   :  { %v2912_v40 = vpop.eup %2911 }
0x1717   :  { %v1752_v42 = vsel %vm217_vm2, %v2912_v40, %v1750_v41 }
0x1718   :  { %2631 = vmatmul.mubr.msk.f32.vlgmr.msra.gmra.mrb[20].mxu1 %vm219_vm3, %v1752_v42 }
0x1719   :  { %2819 = vmatpush3.bf16.msra.mxu1 %v3321_v43  ;;  %2676 = vmatprep.mubr.msk.f32.mxu1 %vm3129_vm0, %v3128_v0 }
0x171a   :  { %2820 = vmatprep.subr.bf16.mxu1 %v3130_v1 }
0x171d   :  { %2822 = vmatpush3.bf16.msra.mxu1 %v3324_v45 }
0x17eb   :  { %v1822_v44 = vpop.f32.mrb[20].mxu1 }
0x17ec   :  { %v1823_v46 = vadd.f32 %v3313_v25, %v1822_v44  ;;  %v2632_v47 = vpop.f32.mrb[21].mxu1 }
0x17ee   :  { %2913 = vtanh.f32 %v1823_v46  ;;  %v2265_v49 = vmul.f32 -1.442695, %v1823_v46 }
0x17f0   :  { %2915 = vpow2.f32 %v2265_v49 }
0x17f8   :  { %v2914_v48 = vpop.eup %2913 }
0x17f9   :  { %1835 = vrot.lane.b32.xlu0 %v2914_v48, %s3132_s4 }
0x17fa   :  { %v2916_v50 = vpop.eup %2915 }
0x17fb   :  { %v1829_v52 = vadd.f32 1.0, %v2916_v50 }
0x17fd   :  { %2917 = vrcp.f32 %v1829_v52 }
0x1807   :  { %v2918_v43 = vpop.eup %2917 }
0x1808   :  { %v1833_v55 = vmul.f32 %v2918_v43, %v1588_v27 }
0x186b   :  { %v1836_v53 = vpop.permute.xlu0 %1835 }
0x186c   :  { %v1838_v54 = vmul.f32 %v2918_v43, %v1836_v53 }
0x186e   :  { %1840 = vrot.lane.b32.xlu1 %v1838_v54, %s3131_s21 }
0x18e0   :  { %v1841_v45 = vpop.permute.xlu1 %1840 }
0x18e1   :  { %v1843_v56 = vadd.f32 %v1841_v45, %v1833_v55 }
0x18e3   :  { %2919 = vtanh.f32 %v1843_v56 }
0x18ed   :  { %v2920_v57 = vpop.eup %2919 }
0x18ee   :  { %1846 = vrot.lane.b32.xlu0 %v2920_v57, %s3132_s4 }
0x1960   :  { %v1847_v58 = vpop.permute.xlu0 %1846 }
0x1961   :  { %v1849_v59 = vmul.f32 %v2918_v43, %v1847_v58 }
0x1963   :  { %2004 = vrot.lane.b32.xlu0 %v1849_v59, %s3132_s4  ;;  %1851 = vrot.lane.b32.xlu1 %v1849_v59, %s3131_s21 }
0x19d5   :  { %v1852_v60 = vpop.permute.xlu1 %1851  ;;  %v2005_v5 = vpop.permute.xlu0 %2004 }
0x19d6   :  { %2642 = vmatmul.mubr.msk.f32.vlgmr.msra.gmra.mrb[18].mxu0 %vm217_vm2, %v1852_v60 }
0x19d7   :  { %2645 = vmatpush3.msra.mxu0 %v3275_v2  ;;  %2646 = vmatprep.mubr.msk.f32.mxu0 %vm3129_vm0, %v3128_v0 }
0x19d8   :  { %2805 = vmatprep.subr.bf16.mxu0 %v3130_v1 }
0x19da   :  { %2647 = vmatmul.mubr.msk.f32.vlgmr.msra.gmra.mrb[20].mxu0 %vm138_vm1, %v1929_v61 }
0x19db   :  { %2807 = vmatpush3.bf16.msra.mxu0 %v3283_v7  ;;  %2665 = vmatprep.mubr.msk.f32.mxu0 %vm3129_vm0, %v3128_v0 }
0x19dc   :  { %2808 = vmatprep.subr.bf16.mxu0 %v3130_v1 }
0x19df   :  { %2810 = vmatpush3.bf16.msra.mxu0 %v3287_v10 }
0x19e0   :  { %2811 = vmatprep.subr.bf16.mxu0 %v3130_v1 }
0x19e3   :  { %2813 = vmatpush3.bf16.msra.mxu0 %v3290_v13 }
0x19e4   :  { %2814 = vmatprep.subr.bf16.mxu0 %v3130_v1 }
0x19e7   :  { %2816 = vmatpush3.bf16.msra.mxu0 %v3294_v16 }
0x1aa9   :  { %v1921_v2 = vpop.f32.mrb[18].mxu0 }
0x1aaa   :  { %v1922_v62 = vadd.f32 %v3355_v51, %v1921_v2  ;;  %v2643_v63 = vpop.f32.mrb[19].mxu0 }
0x1aac   :  { %2921 = vtanh.f32 %v1922_v62 }
0x1aad   :  { %v1999_v7 = vpop.f32.mrb[20].mxu0 }
0x1aae   :  { %v2000_v0 = vadd.f32 %v3303_v18, %v1999_v7  ;;  %v2648_v3 = vpop.f32.mrb[21].mxu0 }
0x1ab0   :  { %2923 = vtanh.f32 %v2000_v0 }
0x1ab6   :  { %v2922_v4 = vpop.eup %2921 }
0x1ab7   :  { %1927 = vst [vmem:[#allocation11 + $0x30] sm:$0xff] %v2922_v4 }
0x1aba   :  { %v2924_v10 = vpop.eup %2923 }
0x1abb   :  { %v2007_v13 = vsel %vm217_vm2, %v2924_v10, %v2005_v5 }
0x1abc   :  { %2666 = vmatmul.mubr.msk.f32.vlgmr.msra.gmra.mrb[22].mxu0 %vm219_vm3, %v2007_v13 }
0x1b8f   :  { %v2077_v1 = vpop.f32.mrb[22].mxu0 }
0x1b90   :  { %v2078_v16 = vadd.f32 %v3313_v25, %v2077_v1  ;;  %v2667_v6 = vpop.f32.mrb[23].mxu0 }
0x1b92   :  { %2925 = vtanh.f32 %v2078_v16  ;;  %v2269_v9 = vmul.f32 -1.442695, %v2078_v16 }
0x1b94   :  { %2927 = vpow2.f32 %v2269_v9 }
0x1b9c   :  { %v2926_v8 = vpop.eup %2925 }
0x1b9d   :  { %2090 = vrot.lane.b32.xlu1 %v2926_v8, %s3132_s4 }
0x1b9e   :  { %v2928_v18 = vpop.eup %2927 }
0x1b9f   :  { %v2084_v11 = vadd.f32 1.0, %v2928_v18 }
0x1ba1   :  { %2929 = vrcp.f32 %v2084_v11 }
0x1bab   :  { %v2930_v12 = vpop.eup %2929 }
0x1bac   :  { %v2088_v17 = vmul.f32 %v2930_v12, %v1843_v56 }
0x1c0f   :  { %v2091_v14 = vpop.permute.xlu1 %2090 }
0x1c10   :  { %v2093_v15 = vmul.f32 %v2930_v12, %v2091_v14 }
0x1c12   :  { %2095 = vrot.lane.b32.xlu0 %v2093_v15, %s3131_s21 }
0x1c84   :  { %v2096_v19 = vpop.permute.xlu0 %2095 }
0x1c85   :  { %v2098_v20 = vadd.f32 %v2096_v19, %v2088_v17 }
0x1c87   :  { %2931 = vtanh.f32 %v2098_v20 }
0x1c91   :  { %v2932_v25 = vpop.eup %2931 }
0x1c92   :  { %2101 = vrot.lane.b32.xlu1 %v2932_v25, %s3132_s4 }
0x1c96   :  { %2186 = vrot.lane.b32.xlu1 %v2098_v20, %s3133_s8 }
0x1d04   :  { %v2102_v21 = vpop.permute.xlu1 %2101 }
0x1d05   :  { %v2104_v22 = vmul.f32 %v2930_v12, %v2102_v21 }
0x1d07   :  { %2106 = vrot.lane.b32.xlu0 %v2104_v22, %s3131_s21 }
0x1d08   :  { %v2187_v23 = vpop.permute.xlu1 %2186 }
0x1d09   :  { %2189 = vst.msk [vmem:[#allocation14] sm:$0xff] %vm217_vm2, %v2187_v23 }
0x1d79   :  { %v2107_v24 = vpop.permute.xlu0 %2106 }
0x1d7a   :  { %2184 = vst.msk [vmem:[#allocation12] sm:$0xff] %vm217_vm2, %v2107_v24  ;;  %2677 = vmatmul.mubr.msk.f32.vlgmr.msra.gmra.mrb[22].mxu1 %vm217_vm2, %v2107_v24 }
0x1d7b   :  { %3056 = shalt.err (!%p3053_p2)
}
0x1d7c   :  { %s3057_s29 = scalar_lea.hbm %s3610_s10, 128 }
0x1d7d   :  { %p3058_p3 = scmp.ne.s32.totalorder %s3610_s10, %s3057_s29  ;;  %p3061_p4 = scmp.lt.u32.totalorder %s3057_s29, %s3610_s10 }
0x1d7f   :  { %p3063_p5 = pnand %p3061_p4, %p3058_p3 }
0x1d81   :  { %3066 = shalt.err (!%p3063_p5)
}
0x1d82   :  { %2211 = dma.vmem_to_hbm [thread:$0]  %s2209_s27, 128, %s3610_s10, [#allocation13]  }
0x1d83   :  { %s3135_s19 = smov [#allocation14]  }
0x1d84   :  { %s2218_s2 = sshll.u32 %s3135_s19, 4  ;;  %s2219_s2 = int_to_ptr.vmem [resolvable:$true] %s2218_s2 }
0x1d85   :  { %s3067_s17 = scalar_lea.vmem %s2219_s2, 128  ;;  %p3072_p7 = scmp.lt.s32.totalorder %s2219_s2, %s2219_s2 }
0x1d86   :  { %p3068_p6 = scmp.ne.s32.totalorder %s2219_s2, %s3067_s17  ;;  %p3073_p8 = scmp.lt.s32.totalorder %s3067_s17, %s3067_s17 }
0x1d88   :  { %p3074_p9 = por %p3073_p8, %p3072_p7 }
0x1d8a   :  { %p3075_p10 = pnand %p3074_p9, %p3068_p6 }
0x1d8c   :  { %3078 = shalt.err (!%p3075_p10)
}
0x1d8d   :  { %s3079_s21 = scalar_lea.hbm %s3611_s11, 128 }
0x1d8e   :  { %p3080_p11 = scmp.ne.s32.totalorder %s3611_s11, %s3079_s21  ;;  %p3083_p12 = scmp.lt.u32.totalorder %s3079_s21, %s3611_s11 }
0x1d90   :  { %p3085_p13 = pnand %p3083_p12, %p3080_p11 }
0x1d92   :  { %3088 = shalt.err (!%p3085_p13)
}
0x1d93   :  { %2221 = dma.vmem_to_hbm [thread:$0]  %s2219_s2, 128, %s3611_s11, [#allocation13]  }
0x1d94   :  { %s3136_s6 = smov [#allocation11]  }
0x1d95   :  { %s2195_s25 = sshll.u32 %s3136_s6, 4  ;;  %s2196_s25 = int_to_ptr.vmem [resolvable:$true] %s2195_s25 }
0x1d96   :  { %s3089_s8 = scalar_lea.vmem %s2196_s25, 1024  ;;  %p3094_p1 = scmp.lt.s32.totalorder %s2196_s25, %s2196_s25 }
0x1d97   :  { %p3090_p0 = scmp.ne.s32.totalorder %s2196_s25, %s3089_s8  ;;  %p3095_p2 = scmp.lt.s32.totalorder %s3089_s8, %s3089_s8 }
0x1d99   :  { %p3096_p3 = por %p3095_p2, %p3094_p1 }
0x1d9b   :  { %p3097_p4 = pnand %p3096_p3, %p3090_p0 }
0x1e4d   :  { %v2176_v26 = vpop.f32.mrb[22].mxu1 }
0x1e4e   :  { %v2177_v27 = vadd.f32 %v3355_v51, %v2176_v26  ;;  %v2678_v28 = vpop.f32.mrb[23].mxu1 }
0x1e50   :  { %2933 = vtanh.f32 %v2177_v27 }
0x1e5a   :  { %v2934_v29 = vpop.eup %2933 }
0x1e5b   :  { %2182 = vst [vmem:[#allocation11 + $0x38] sm:$0xff] %v2934_v29 }
0x1e5c   :  { %3100 = shalt.err (!%p3097_p4)
}
0x1e5d   :  { %s3101_s11 = scalar_lea.hbm %s3609_s9, 1024 }
0x1e5e   :  { %p3102_p5 = scmp.ne.s32.totalorder %s3609_s9, %s3101_s11  ;;  %p3105_p6 = scmp.lt.u32.totalorder %s3101_s11, %s3609_s9 }
0x1e60   :  { %p3107_p7 = pnand %p3105_p6, %p3102_p5 }
0x1e62   :  { %3110 = shalt.err (!%p3107_p7)
}
0x1e63   :  { %2201 = dma.vmem_to_hbm [thread:$0]  %s2196_s25, 1024, %s3609_s9, [#allocation4], %s3124_s18, %s3124_s18, %s3125_s22  }
0x1e64   :  { %3117 = dma.done.wait [#allocation4], 1024  }
0x1e65   :  { %3118 = vsyncadd [#allocation4], 4294966272 }
0x1e66   :  { %3119 = dma.done.wait [#allocation13], 256  }
0x1e67   :  { %3120 = vsyncadd [#allocation13], 4294967040 }
0x1e68   :  { %2231 = vsyncpa [#allocation3], 1 }
0x1e69   :  { %2232 = vsyncpa [#allocation6], 1 }
0x1e6a   :  { %2233 = vsyncpa [#allocation9], 1 }
0x1e6b   :  { %2234 = vsyncpa [#allocation4], 1 }
0x1e6c   :  { %2235 = vsyncpa [#allocation13], 1 }

</bundles_post_ra>
